<compile_context>
chip_gen: v6e
topology: v6e:2x2x1
jax: 0.10.0
libtpu: 0.0.40
codegen_flags: <defaults>
</compile_context>

<pallas_src>
import functools

import jax
import jax.numpy as jnp
from jax import lax
from jax.experimental import pallas as pl
from jax.experimental.pallas import tpu as pltpu

EPS = 1e-5  # torch.nn.InstanceNorm2d default


def _round_up(x, m):
    return (x + m - 1) // m * m


def _vmem_capacity_bytes():
    try:
        return int(pltpu.get_tpu_info().vmem_capacity_bytes)
    except Exception:
        return 64 * 1024 * 1024  # conservative (v7x-sized) fallback


# ---------------------------------------------------------------------------
# Pass 1: in-kernel im2col (K*K shifted-tap matmuls) + per-(n, channel)
#         running sum / sum-of-squares.
# ---------------------------------------------------------------------------
def _conv_stats_kernel(img_ref, w_ref, conv_ref, stats_ref, *,
                       K, stride, TH, Wout, C):
    # img_ref:   (Hp_pad, Wp, C)   padded NHWC image, resident per batch
    # w_ref:     (K*K, C, OCp)     per-tap weights, resident
    # conv_ref:  (TP, OCp)         conv tile (compute dtype), TP = TH*Wout
    # stats_ref: (2, OCp)          f32 [sum; sumsq], resident across t
    t = pl.program_id(1)

    @pl.when(t == 0)
    def _():
        stats_ref[...] = jnp.zeros_like(stats_ref)

    TP = TH * Wout
    OCp = conv_ref.shape[-1]
    row0 = pl.multiple_of(t * (TH * stride), 8)   # TH is a multiple of 8

    acc = jnp.zeros((TP, OCp), jnp.float32)
    for ki in range(K):
        for kj in range(K):
            if stride == 1:
                tap = img_ref[pl.ds(row0 + ki, TH), pl.ds(kj, Wout), :]
            else:
                tap = img_ref[pl.ds(row0 + ki, TH, stride=stride),
                              pl.ds(kj, Wout, stride=stride), :]
            acc = acc + jnp.dot(tap.reshape(TP, C), w_ref[ki * K + kj],
                                preferred_element_type=jnp.float32)

    conv_ref[...] = acc.astype(conv_ref.dtype)
    # Separate row updates (no concatenate -> no per-tile relayout copy).
    stats_ref[0:1, :] += jnp.sum(acc, axis=0, keepdims=True)
    stats_ref[1:2, :] += jnp.sum(acc * acc, axis=0, keepdims=True)


# ---------------------------------------------------------------------------
# Pass 2: fused InstanceNorm (affine) + ReLU, emitted in NCHW orientation.
# ---------------------------------------------------------------------------
def _norm_relu_kernel(inv_p, conv_ref, stats_ref, gb_ref, o_ref):
    # conv_ref:  (TPp, TC) compute dtype
    # stats_ref: (2, TC)   f32 [sum; sumsq]
    # gb_ref:    (2, TC)   f32 [gamma; beta]
    # o_ref:     (TC, TPp) output dtype (channel-major / NCHW layout)
    x = conv_ref[...].astype(jnp.float32)
    mean = stats_ref[0:1, :] * inv_p
    var = jnp.maximum(stats_ref[1:2, :] * inv_p - mean * mean, 0.0)
    scale = gb_ref[0:1, :] * lax.rsqrt(var + EPS)          # EUP rsqrt
    shift = gb_ref[1:2, :] - mean * scale
    y = jnp.maximum(x * scale + shift, 0.0)                 # (TPp, TC)
    o_ref[...] = y.T.astype(o_ref.dtype)                    # XLU transpose


def conv_norm_layer(x, w, b, gamma, beta, kernel_size, stride,
                    compute_dtype=jnp.bfloat16):
    """x: (N, C, H, W) f32.  w: (OC, C, K, K).  Returns (N, OC, Hout, Wout)."""
    N, C, H, W = x.shape
    OC = w.shape[0]
    K = kernel_size
    pad = K // 2

    # Conv bias cancels exactly under InstanceNorm (per-channel mean removal).
    del b

    # ---- host glue: reflection pad + NCHW->NHWC (un-expanded, cheap) ----
    xp_nchw = jnp.pad(x, ((0, 0), (0, 0), (pad, pad), (pad, pad)),
                      mode="reflect")
    Hp, Wp = H + 2 * pad, W + 2 * pad
    Hout = (Hp - K) // stride + 1
    Wout = (Wp - K) // stride + 1
    P = Hout * Wout

    itemsize = jnp.dtype(compute_dtype).itemsize
    sub = 8 * (4 // itemsize)            # sublane packing: 8 (f32) / 16 (bf16)

    # lane-dense channel padding; match the 256-wide MXU (v6e/v7x) for OC>128
    OCp = _round_up(OC, 256) if OC > 128 else _round_up(OC, 128)
    TC = 128

    # ---- generation-aware VMEM budget ----
    cap = _vmem_capacity_bytes()          # 128 MiB (v5e/v6e) / 64 MiB (v7x)
    budget = int(cap * 0.45)
    vmem_limit = max(32 * 1024 * 1024, min(int(cap * 0.85), 112 * 1024 * 1024))

    # ---- pass-1 tile height (output rows per grid step), VMEM-accounted:
    #      resident image + weight panel + stats + conv block + f32 acc ----
    img_plane = _round_up(Wp, sub) * _round_up(C, 128) * itemsize
    w_bytes = K * K * _round_up(C, sub) * OCp * itemsize
    stats_bytes = 8 * OCp * 4
    fixed = (2 * (stride * (_round_up(Hout, 8) - 1) + K) * img_plane
             + 2 * w_bytes + 2 * stats_bytes)
    per_hrow = Wout * (2 * OCp * itemsize        # conv out block (double buf)
                       + OCp * 4                 # f32 accumulator
                       + 2 * _round_up(C, 128) * itemsize)  # tap temporaries
    avail = max(budget - fixed, 8 * per_hrow)
    TH = max(8, min(avail // per_hrow, _round_up(Hout, 8)) // 8 * 8)

    n_t1 = -(-Hout // TH)                 # cdiv
    Hout_p = n_t1 * TH
    TP = TH * Wout
    Hp_pad = max(Hp, stride * (Hout_p - 1) + K)

    x_nhwc = jnp.transpose(xp_nchw, (0, 2, 3, 1)).astype(compute_dtype)
    if Hp_pad > Hp:
        # zero rows: conv of zeros (no bias) = 0 -> contributes 0 to sum/sumsq
        x_nhwc = jnp.pad(x_nhwc, ((0, 0), (0, Hp_pad - Hp), (0, 0), (0, 0)))

    # tap-major weight layout (K*K, C, OC); only the tiny weight is permuted.
    w_taps = jnp.transpose(w, (2, 3, 1, 0)).reshape(K * K, C, OC)
    gb = jnp.stack([gamma, beta], axis=0).astype(jnp.float32)      # (2, OC)
    if OCp != OC:
        w_taps = jnp.pad(w_taps, ((0, 0), (0, 0), (0, OCp - OC)))
        gb = jnp.pad(gb, ((0, 0), (0, OCp - OC)))
    w_taps = w_taps.astype(compute_dtype)

    # flat spatial length (rows >= Hout_p*Wout are never written; sliced off)
    Pp = _round_up(Hout_p * Wout, 128)

    # --- pass 1: conv (in-kernel im2col) + per-channel running stats ---
    kernel1 = functools.partial(_conv_stats_kernel, K=K, stride=stride,
                                TH=TH, Wout=Wout, C=C)
    conv_out, stats = pl.pallas_call(
        kernel1,
        out_shape=(jax.ShapeDtypeStruct((N, Pp, OCp), compute_dtype),
                   jax.ShapeDtypeStruct((N, 2, OCp), jnp.float32)),
        grid=(N, n_t1),
        in_specs=[
            pl.BlockSpec((pl.Squeezed(), Hp_pad, Wp, C),
                         lambda n, t: (n, 0, 0, 0)),          # resident image
            pl.BlockSpec((K * K, C, OCp), lambda n, t: (0, 0, 0)),
        ],
        out_specs=(
            pl.BlockSpec((pl.Squeezed(), TP, OCp), lambda n, t: (n, t, 0)),
            pl.BlockSpec((pl.Squeezed(), 2, OCp), lambda n, t: (n, 0, 0)),
        ),
        compiler_params=pltpu.CompilerParams(
            dimension_semantics=("parallel", "arbitrary"),
            vmem_limit_bytes=vmem_limit),
    )(x_nhwc, w_taps)

    # ---- pass-2 spatial tile: multiple of 128 that divides Pp exactly ----
    out_item = jnp.dtype(x.dtype).itemsize
    per_prow = 2 * TC * itemsize + 2 * TC * out_item + 2 * TC * 4
    max_rows = max(128, budget // per_prow)
    units = Pp // 128
    best = 1
    for d in range(1, units + 1):
        if units % d == 0 and 128 * d <= max_rows:
            best = d
    TPp = 128 * best
    n_t2 = Pp // TPp

    # --- pass 2: fused normalize + affine + ReLU, NCHW-oriented output ---
    kernel2 = functools.partial(_norm_relu_kernel, 1.0 / float(P))
    out = pl.pallas_call(
        kernel2,
        out_shape=jax.ShapeDtypeStruct((N, OCp, Pp), x.dtype),
        grid=(N, OCp // TC, n_t2),
        in_specs=[
            pl.BlockSpec((pl.Squeezed(), TPp, TC), lambda n, c, p: (n, p, c)),
            pl.BlockSpec((pl.Squeezed(), 2, TC), lambda n, c, p: (n, 0, c)),
            pl.BlockSpec((2, TC), lambda n, c, p: (0, c)),
        ],
        out_specs=pl.BlockSpec((pl.Squeezed(), TC, TPp),
                               lambda n, c, p: (n, c, p)),
        compiler_params=pltpu.CompilerParams(
            dimension_semantics=("parallel", "parallel", "parallel"),
            vmem_limit_bytes=vmem_limit),
    )(conv_out, stats, gb)

    # host epilogue: un-padding slice + free reshape (no layout transpose).
    return out[:, :OC, :P].reshape(N, OC, Hout, Wout)


def _reference(x, w, b, gamma, beta, kernel_size, stride):
    """Pure-JAX reference matching the PyTorch module semantics (incl. bias)."""
    K = kernel_size
    pad = K // 2
    xp = jnp.pad(x, ((0, 0), (0, 0), (pad, pad), (pad, pad)), mode="reflect")
    y = lax.conv_general_dilated(
        xp, w, window_strides=(stride, stride), padding="VALID",
        dimension_numbers=("NCHW", "OIHW", "NCHW"))
    y = y + b[None, :, None, None]
    mean = y.mean(axis=(2, 3), keepdims=True)
    var = ((y - mean) ** 2).mean(axis=(2, 3), keepdims=True)
    yh = (y - mean) / jnp.sqrt(var + EPS)
    out = yh * gamma[None, :, None, None] + beta[None, :, None, None]
    return jnp.maximum(out, 0.0)


if __name__ == "__main__":
    N, C_IN, C_OUT = 2, 4, 8
    H = W = 16
    K, STRIDE = 3, 1

    key = jax.random.PRNGKey(0)
    kx, kw, kb, kg, kbt = jax.random.split(key, 5)

    x = jax.random.normal(kx, (N, C_IN, H, W), dtype=jnp.float32)
    w = jax.random.normal(kw, (C_OUT, C_IN, K, K), dtype=jnp.float32) * 0.1
    b = jax.random.normal(kb, (C_OUT,), dtype=jnp.float32) * 0.1
    gamma = 1.0 + 0.1 * jax.random.normal(kg, (C_OUT,), dtype=jnp.float32)
    beta = 0.1 * jax.random.normal(kbt, (C_OUT,), dtype=jnp.float32)

    ref = jax.block_until_ready(_reference(x, w, b, gamma, beta, K, STRIDE))

    # exact-semantics check (f32 compute path; also demonstrates the exact
    # bias cancellation under InstanceNorm since the kernel never sees b)
    out_f32 = jax.block_until_ready(
        conv_norm_layer(x, w, b, gamma, beta, K, STRIDE,
                        compute_dtype=jnp.float32))
    assert out_f32.shape == (N, C_OUT, H, W), out_f32.shape
    err_f32 = float(jnp.max(jnp.abs(out_f32 - ref)))
    assert err_f32 < 3e-4, err_f32

    # fast path: bf16 MXU operands + bf16 conv_out intermediate (f32 stats)
    out_bf16 = jax.block_until_ready(
        conv_norm_layer(x, w, b, gamma, beta, K, STRIDE,
                        compute_dtype=jnp.bfloat16))
    err_bf16 = float(jnp.max(jnp.abs(out_bf16 - ref)))
    assert err_bf16 < 1e-1, err_bf16

    print("KERNEL_OK")
</pallas_src>

<mosaic_0001>
module attributes {stable_mosaic.version = 11 : i64} {
  func.func @_conv_stats_kernel(%arg0: i32, %arg1: i32, %arg2: memref<1x18x18x4xf32, #tpu.memory_space<vmem>>, %arg3: memref<9x4x128xf32, #tpu.memory_space<vmem>>, %arg4: memref<1x256x128xf32, #tpu.memory_space<vmem>>, %arg5: memref<1x2x128xf32, #tpu.memory_space<vmem>>) attributes {dimension_semantics = [#tpu.dimension_semantics<parallel>, #tpu.dimension_semantics<arbitrary>], iteration_bounds = array<i64: 2, 1>, scalar_prefetch = 0 : i64, scratch_operands = 0 : i64, tpu.core_type = #tpu.core_type<tc>, window_params = [{transform_indices = @transform_0, window_bounds = array<i64: 1, 18, 18, 4>}, {pipeline_mode = #tpu.pipeline_mode<synchronous>, transform_indices = @transform_1, window_bounds = array<i64: 9, 4, 128>}, {transform_indices = @transform_2, window_bounds = array<i64: 1, 256, 128>}, {transform_indices = @transform_3, window_bounds = array<i64: 1, 2, 128>}]} {
    %c0_i32 = arith.constant 0 : i32
    %0 = arith.cmpi eq, %arg1, %c0_i32 : i32
    %1 = arith.extui %0 : i1 to i32
    %c0_i32_0 = arith.constant 0 : i32
    %2 = arith.cmpi ne, %1, %c0_i32_0 : i32
    scf.if %2 {
      %cst_79 = arith.constant 0.000000e+00 : f32
      %107 = vector.broadcast %cst_79 : f32 to vector<2x128xf32>
      %c0_80 = arith.constant 0 : index
      %c0_81 = arith.constant 0 : index
      %c0_82 = arith.constant 0 : index
      %108 = vector.load %arg5[%c0_80, %c0_81, %c0_82] : memref<1x2x128xf32, #tpu.memory_space<vmem>>, vector<1x2x128xf32>
      %109 = vector.shape_cast %108 : vector<1x2x128xf32> to vector<2x128xf32>
      %110 = vector.shape_cast %107 : vector<2x128xf32> to vector<1x2x128xf32>
      tpu.vector_store %arg5[%c0_80, %c0_81, %c0_82], %110 {strides = array<i32>} : memref<1x2x128xf32, #tpu.memory_space<vmem>>, vector<1x2x128xf32>,
    } else {
    }
    %c16_i32 = arith.constant 16 : i32
    %3 = arith.muli %arg1, %c16_i32 : i32
    %4 = tpu.assume_multiple %3, 8 : i32
    %cst = arith.constant 0.000000e+00 : f32
    %5 = vector.broadcast %cst : f32 to vector<256x128xf32>
    %c0_i32_1 = arith.constant 0 : i32
    %6 = arith.addi %4, %c0_i32_1 : i32
    %c0 = arith.constant 0 : index
    %7 = arith.index_cast %6 : i32 to index
    %c0_2 = arith.constant 0 : index
    %c0_3 = arith.constant 0 : index
    %8 = vector.load %arg2[%c0, %7, %c0_2, %c0_3] : memref<1x18x18x4xf32, #tpu.memory_space<vmem>>, vector<1x16x16x4xf32>
    %9 = vector.shape_cast %8 : vector<1x16x16x4xf32> to vector<16x16x4xf32>
    %10 = vector.shape_cast %9 : vector<16x16x4xf32> to vector<256x4xf32>
    %c0_4 = arith.constant 0 : index
    %c0_5 = arith.constant 0 : index
    %c0_6 = arith.constant 0 : index
    %11 = vector.load %arg3[%c0_4, %c0_5, %c0_6] : memref<9x4x128xf32, #tpu.memory_space<vmem>>, vector<1x4x128xf32>
    %12 = vector.shape_cast %11 : vector<1x4x128xf32> to vector<4x128xf32>
    %cst_7 = arith.constant dense<0.000000e+00> : vector<256x128xf32>
    %13 = tpu.matmul %10, %12, %cst_7 {dimension_numbers = #tpu.dot_dimension_numbers<[1], [0], [0], [1], [0, 0, 1, 1], [], []>} : vector<256x4xf32>, vector<4x128xf32>, vector<256x128xf32> -> vector<256x128xf32>
    %14 = arith.addf %5, %13 : vector<256x128xf32>
    %c0_i32_8 = arith.constant 0 : i32
    %15 = arith.addi %4, %c0_i32_8 : i32
    %c0_9 = arith.constant 0 : index
    %16 = arith.index_cast %15 : i32 to index
    %c1 = arith.constant 1 : index
    %c0_10 = arith.constant 0 : index
    %17 = vector.load %arg2[%c0_9, %16, %c1, %c0_10] : memref<1x18x18x4xf32, #tpu.memory_space<vmem>>, vector<1x16x16x4xf32>
    %18 = vector.shape_cast %17 : vector<1x16x16x4xf32> to vector<16x16x4xf32>
    %19 = vector.shape_cast %18 : vector<16x16x4xf32> to vector<256x4xf32>
    %c1_11 = arith.constant 1 : index
    %c0_12 = arith.constant 0 : index
    %c0_13 = arith.constant 0 : index
    %20 = vector.load %arg3[%c1_11, %c0_12, %c0_13] : memref<9x4x128xf32, #tpu.memory_space<vmem>>, vector<1x4x128xf32>
    %21 = vector.shape_cast %20 : vector<1x4x128xf32> to vector<4x128xf32>
    %cst_14 = arith.constant dense<0.000000e+00> : vector<256x128xf32>
    %22 = tpu.matmul %19, %21, %cst_14 {dimension_numbers = #tpu.dot_dimension_numbers<[1], [0], [0], [1], [0, 0, 1, 1], [], []>} : vector<256x4xf32>, vector<4x128xf32>, vector<256x128xf32> -> vector<256x128xf32>
    %23 = arith.addf %14, %22 : vector<256x128xf32>
    %c0_i32_15 = arith.constant 0 : i32
    %24 = arith.addi %4, %c0_i32_15 : i32
    %c0_16 = arith.constant 0 : index
    %25 = arith.index_cast %24 : i32 to index
    %c2 = arith.constant 2 : index
    %c0_17 = arith.constant 0 : index
    %26 = vector.load %arg2[%c0_16, %25, %c2, %c0_17] : memref<1x18x18x4xf32, #tpu.memory_space<vmem>>, vector<1x16x16x4xf32>
    %27 = vector.shape_cast %26 : vector<1x16x16x4xf32> to vector<16x16x4xf32>
    %28 = vector.shape_cast %27 : vector<16x16x4xf32> to vector<256x4xf32>
    %c2_18 = arith.constant 2 : index
    %c0_19 = arith.constant 0 : index
    %c0_20 = arith.constant 0 : index
    %29 = vector.load %arg3[%c2_18, %c0_19, %c0_20] : memref<9x4x128xf32, #tpu.memory_space<vmem>>, vector<1x4x128xf32>
    %30 = vector.shape_cast %29 : vector<1x4x128xf32> to vector<4x128xf32>
    %cst_21 = arith.constant dense<0.000000e+00> : vector<256x128xf32>
    %31 = tpu.matmul %28, %30, %cst_21 {dimension_numbers = #tpu.dot_dimension_numbers<[1], [0], [0], [1], [0, 0, 1, 1], [], []>} : vector<256x4xf32>, vector<4x128xf32>, vector<256x128xf32> -> vector<256x128xf32>
    %32 = arith.addf %23, %31 : vector<256x128xf32>
    %c1_i32 = arith.constant 1 : i32
    %33 = arith.addi %4, %c1_i32 : i32
    %c0_22 = arith.constant 0 : index
    %34 = arith.index_cast %33 : i32 to index
    %c0_23 = arith.constant 0 : index
    %c0_24 = arith.constant 0 : index
    %35 = vector.load %arg2[%c0_22, %34, %c0_23, %c0_24] : memref<1x18x18x4xf32, #tpu.memory_space<vmem>>, vector<1x16x16x4xf32>
    %36 = vector.shape_cast %35 : vector<1x16x16x4xf32> to vector<16x16x4xf32>
    %37 = vector.shape_cast %36 : vector<16x16x4xf32> to vector<256x4xf32>
    %c3 = arith.constant 3 : index
    %c0_25 = arith.constant 0 : index
    %c0_26 = arith.constant 0 : index
    %38 = vector.load %arg3[%c3, %c0_25, %c0_26] : memref<9x4x128xf32, #tpu.memory_space<vmem>>, vector<1x4x128xf32>
    %39 = vector.shape_cast %38 : vector<1x4x128xf32> to vector<4x128xf32>
    %cst_27 = arith.constant dense<0.000000e+00> : vector<256x128xf32>
    %40 = tpu.matmul %37, %39, %cst_27 {dimension_numbers = #tpu.dot_dimension_numbers<[1], [0], [0], [1], [0, 0, 1, 1], [], []>} : vector<256x4xf32>, vector<4x128xf32>, vector<256x128xf32> -> vector<256x128xf32>
    %41 = arith.addf %32, %40 : vector<256x128xf32>
    %c1_i32_28 = arith.constant 1 : i32
    %42 = arith.addi %4, %c1_i32_28 : i32
    %c0_29 = arith.constant 0 : index
    %43 = arith.index_cast %42 : i32 to index
    %c1_30 = arith.constant 1 : index
    %c0_31 = arith.constant 0 : index
    %44 = vector.load %arg2[%c0_29, %43, %c1_30, %c0_31] : memref<1x18x18x4xf32, #tpu.memory_space<vmem>>, vector<1x16x16x4xf32>
    %45 = vector.shape_cast %44 : vector<1x16x16x4xf32> to vector<16x16x4xf32>
    %46 = vector.shape_cast %45 : vector<16x16x4xf32> to vector<256x4xf32>
    %c4 = arith.constant 4 : index
    %c0_32 = arith.constant 0 : index
    %c0_33 = arith.constant 0 : index
    %47 = vector.load %arg3[%c4, %c0_32, %c0_33] : memref<9x4x128xf32, #tpu.memory_space<vmem>>, vector<1x4x128xf32>
    %48 = vector.shape_cast %47 : vector<1x4x128xf32> to vector<4x128xf32>
    %cst_34 = arith.constant dense<0.000000e+00> : vector<256x128xf32>
    %49 = tpu.matmul %46, %48, %cst_34 {dimension_numbers = #tpu.dot_dimension_numbers<[1], [0], [0], [1], [0, 0, 1, 1], [], []>} : vector<256x4xf32>, vector<4x128xf32>, vector<256x128xf32> -> vector<256x128xf32>
    %50 = arith.addf %41, %49 : vector<256x128xf32>
    %c1_i32_35 = arith.constant 1 : i32
    %51 = arith.addi %4, %c1_i32_35 : i32
    %c0_36 = arith.constant 0 : index
    %52 = arith.index_cast %51 : i32 to index
    %c2_37 = arith.constant 2 : index
    %c0_38 = arith.constant 0 : index
    %53 = vector.load %arg2[%c0_36, %52, %c2_37, %c0_38] : memref<1x18x18x4xf32, #tpu.memory_space<vmem>>, vector<1x16x16x4xf32>
    %54 = vector.shape_cast %53 : vector<1x16x16x4xf32> to vector<16x16x4xf32>
    %55 = vector.shape_cast %54 : vector<16x16x4xf32> to vector<256x4xf32>
    %c5 = arith.constant 5 : index
    %c0_39 = arith.constant 0 : index
    %c0_40 = arith.constant 0 : index
    %56 = vector.load %arg3[%c5, %c0_39, %c0_40] : memref<9x4x128xf32, #tpu.memory_space<vmem>>, vector<1x4x128xf32>
    %57 = vector.shape_cast %56 : vector<1x4x128xf32> to vector<4x128xf32>
    %cst_41 = arith.constant dense<0.000000e+00> : vector<256x128xf32>
    %58 = tpu.matmul %55, %57, %cst_41 {dimension_numbers = #tpu.dot_dimension_numbers<[1], [0], [0], [1], [0, 0, 1, 1], [], []>} : vector<256x4xf32>, vector<4x128xf32>, vector<256x128xf32> -> vector<256x128xf32>
    %59 = arith.addf %50, %58 : vector<256x128xf32>
    %c2_i32 = arith.constant 2 : i32
    %60 = arith.addi %4, %c2_i32 : i32
    %c0_42 = arith.constant 0 : index
    %61 = arith.index_cast %60 : i32 to index
    %c0_43 = arith.constant 0 : index
    %c0_44 = arith.constant 0 : index
    %62 = vector.load %arg2[%c0_42, %61, %c0_43, %c0_44] : memref<1x18x18x4xf32, #tpu.memory_space<vmem>>, vector<1x16x16x4xf32>
    %63 = vector.shape_cast %62 : vector<1x16x16x4xf32> to vector<16x16x4xf32>
    %64 = vector.shape_cast %63 : vector<16x16x4xf32> to vector<256x4xf32>
    %c6 = arith.constant 6 : index
    %c0_45 = arith.constant 0 : index
    %c0_46 = arith.constant 0 : index
    %65 = vector.load %arg3[%c6, %c0_45, %c0_46] : memref<9x4x128xf32, #tpu.memory_space<vmem>>, vector<1x4x128xf32>
    %66 = vector.shape_cast %65 : vector<1x4x128xf32> to vector<4x128xf32>
    %cst_47 = arith.constant dense<0.000000e+00> : vector<256x128xf32>
    %67 = tpu.matmul %64, %66, %cst_47 {dimension_numbers = #tpu.dot_dimension_numbers<[1], [0], [0], [1], [0, 0, 1, 1], [], []>} : vector<256x4xf32>, vector<4x128xf32>, vector<256x128xf32> -> vector<256x128xf32>
    %68 = arith.addf %59, %67 : vector<256x128xf32>
    %c2_i32_48 = arith.constant 2 : i32
    %69 = arith.addi %4, %c2_i32_48 : i32
    %c0_49 = arith.constant 0 : index
    %70 = arith.index_cast %69 : i32 to index
    %c1_50 = arith.constant 1 : index
    %c0_51 = arith.constant 0 : index
    %71 = vector.load %arg2[%c0_49, %70, %c1_50, %c0_51] : memref<1x18x18x4xf32, #tpu.memory_space<vmem>>, vector<1x16x16x4xf32>
    %72 = vector.shape_cast %71 : vector<1x16x16x4xf32> to vector<16x16x4xf32>
    %73 = vector.shape_cast %72 : vector<16x16x4xf32> to vector<256x4xf32>
    %c7 = arith.constant 7 : index
    %c0_52 = arith.constant 0 : index
    %c0_53 = arith.constant 0 : index
    %74 = vector.load %arg3[%c7, %c0_52, %c0_53] : memref<9x4x128xf32, #tpu.memory_space<vmem>>, vector<1x4x128xf32>
    %75 = vector.shape_cast %74 : vector<1x4x128xf32> to vector<4x128xf32>
    %cst_54 = arith.constant dense<0.000000e+00> : vector<256x128xf32>
    %76 = tpu.matmul %73, %75, %cst_54 {dimension_numbers = #tpu.dot_dimension_numbers<[1], [0], [0], [1], [0, 0, 1, 1], [], []>} : vector<256x4xf32>, vector<4x128xf32>, vector<256x128xf32> -> vector<256x128xf32>
    %77 = arith.addf %68, %76 : vector<256x128xf32>
    %c2_i32_55 = arith.constant 2 : i32
    %78 = arith.addi %4, %c2_i32_55 : i32
    %c0_56 = arith.constant 0 : index
    %79 = arith.index_cast %78 : i32 to index
    %c2_57 = arith.constant 2 : index
    %c0_58 = arith.constant 0 : index
    %80 = vector.load %arg2[%c0_56, %79, %c2_57, %c0_58] : memref<1x18x18x4xf32, #tpu.memory_space<vmem>>, vector<1x16x16x4xf32>
    %81 = vector.shape_cast %80 : vector<1x16x16x4xf32> to vector<16x16x4xf32>
    %82 = vector.shape_cast %81 : vector<16x16x4xf32> to vector<256x4xf32>
    %c8 = arith.constant 8 : index
    %c0_59 = arith.constant 0 : index
    %c0_60 = arith.constant 0 : index
    %83 = vector.load %arg3[%c8, %c0_59, %c0_60] : memref<9x4x128xf32, #tpu.memory_space<vmem>>, vector<1x4x128xf32>
    %84 = vector.shape_cast %83 : vector<1x4x128xf32> to vector<4x128xf32>
    %cst_61 = arith.constant dense<0.000000e+00> : vector<256x128xf32>
    %85 = tpu.matmul %82, %84, %cst_61 {dimension_numbers = #tpu.dot_dimension_numbers<[1], [0], [0], [1], [0, 0, 1, 1], [], []>} : vector<256x4xf32>, vector<4x128xf32>, vector<256x128xf32> -> vector<256x128xf32>
    %86 = arith.addf %77, %85 : vector<256x128xf32>
    %c0_62 = arith.constant 0 : index
    %c0_63 = arith.constant 0 : index
    %c0_64 = arith.constant 0 : index
    %87 = vector.load %arg4[%c0_62, %c0_63, %c0_64] : memref<1x256x128xf32, #tpu.memory_space<vmem>>, vector<1x256x128xf32>
    %88 = vector.shape_cast %87 : vector<1x256x128xf32> to vector<256x128xf32>
    %89 = vector.shape_cast %86 : vector<256x128xf32> to vector<1x256x128xf32>
    tpu.vector_store %arg4[%c0_62, %c0_63, %c0_64], %89 {strides = array<i32>} : memref<1x256x128xf32, #tpu.memory_space<vmem>>, vector<1x256x128xf32>,
    %c0_65 = arith.constant 0 : index
    %c0_66 = arith.constant 0 : index
    %c0_67 = arith.constant 0 : index
    %90 = vector.load %arg5[%c0_65, %c0_66, %c0_67] : memref<1x2x128xf32, #tpu.memory_space<vmem>>, vector<1x1x128xf32>
    %91 = vector.shape_cast %90 : vector<1x1x128xf32> to vector<1x128xf32>
    %cst_68 = arith.constant dense<0.000000e+00> : vector<128xf32>
    %92 = vector.multi_reduction <add>, %86, %cst_68 [0] : vector<256x128xf32> to vector<128xf32>
    %93 = vector.shape_cast %92 : vector<128xf32> to vector<1x128xf32>
    %94 = arith.addf %91, %93 : vector<1x128xf32>
    %c0_69 = arith.constant 0 : index
    %c0_70 = arith.constant 0 : index
    %c0_71 = arith.constant 0 : index
    %95 = vector.load %arg5[%c0_69, %c0_70, %c0_71] : memref<1x2x128xf32, #tpu.memory_space<vmem>>, vector<1x1x128xf32>
    %96 = vector.shape_cast %95 : vector<1x1x128xf32> to vector<1x128xf32>
    %97 = vector.shape_cast %94 : vector<1x128xf32> to vector<1x1x128xf32>
    tpu.vector_store %arg5[%c0_69, %c0_70, %c0_71], %97 {strides = array<i32>} : memref<1x2x128xf32, #tpu.memory_space<vmem>>, vector<1x1x128xf32>,
    %c0_72 = arith.constant 0 : index
    %c1_73 = arith.constant 1 : index
    %c0_74 = arith.constant 0 : index
    %98 = vector.load %arg5[%c0_72, %c1_73, %c0_74] : memref<1x2x128xf32, #tpu.memory_space<vmem>>, vector<1x1x128xf32>
    %99 = vector.shape_cast %98 : vector<1x1x128xf32> to vector<1x128xf32>
    %100 = arith.mulf %86, %86 : vector<256x128xf32>
    %cst_75 = arith.constant dense<0.000000e+00> : vector<128xf32>
    %101 = vector.multi_reduction <add>, %100, %cst_75 [0] : vector<256x128xf32> to vector<128xf32>
    %102 = vector.shape_cast %101 : vector<128xf32> to vector<1x128xf32>
    %103 = arith.addf %99, %102 : vector<1x128xf32>
    %c0_76 = arith.constant 0 : index
    %c1_77 = arith.constant 1 : index
    %c0_78 = arith.constant 0 : index
    %104 = vector.load %arg5[%c0_76, %c1_77, %c0_78] : memref<1x2x128xf32, #tpu.memory_space<vmem>>, vector<1x1x128xf32>
    %105 = vector.shape_cast %104 : vector<1x1x128xf32> to vector<1x128xf32>
    %106 = vector.shape_cast %103 : vector<1x128xf32> to vector<1x1x128xf32>
    tpu.vector_store %arg5[%c0_76, %c1_77, %c0_78], %106 {strides = array<i32>} : memref<1x2x128xf32, #tpu.memory_space<vmem>>, vector<1x1x128xf32>,
    return
  }
  func.func @transform_0(%arg0: i32, %arg1: i32) -> (i32, i32, i32, i32) {
    %c0_i32 = arith.constant 0 : i32
    %c0_i32_0 = arith.constant 0 : i32
    %c0_i32_1 = arith.constant 0 : i32
    %c0_i32_2 = arith.constant 0 : i32
    return %arg0, %c0_i32, %c0_i32_0, %c0_i32_1 : i32, i32, i32, i32
  }
  func.func @transform_1(%arg0: i32, %arg1: i32) -> (i32, i32, i32) {
    %c0_i32 = arith.constant 0 : i32
    %c0_i32_0 = arith.constant 0 : i32
    %c0_i32_1 = arith.constant 0 : i32
    %c0_i32_2 = arith.constant 0 : i32
    return %c0_i32, %c0_i32_0, %c0_i32_1 : i32, i32, i32
  }
  func.func @transform_2(%arg0: i32, %arg1: i32) -> (i32, i32, i32) {
    %c0_i32 = arith.constant 0 : i32
    %c0_i32_0 = arith.constant 0 : i32
    return %arg0, %arg1, %c0_i32 : i32, i32, i32
  }
  func.func @transform_3(%arg0: i32, %arg1: i32) -> (i32, i32, i32) {
    %c0_i32 = arith.constant 0 : i32
    %c0_i32_0 = arith.constant 0 : i32
    %c0_i32_1 = arith.constant 0 : i32
    return %arg0, %c0_i32, %c0_i32_0 : i32, i32, i32
  }
}

</mosaic_0001>

<bundles_post_ra>
// kernel: tpu_custom_call.1
= control target key start
LH: loop header
LB: loop body
LE: loop exit
PB: predicated region body
PF: predicated region fallthrough
CT: control target
= control target key end

     0   :  { %9 = vsyncpa [#allocation3], 0  ;;  %s7003_s0 = inlined_call_operand.vmem [shape: f32[2,18,18,4], index: 0, kind: input, shape index: {}]   ;;  %s7004_s1 = inlined_call_operand.vmem [shape: f32[9,4,128], index: 1, kind: input, shape index: {}]   ;;  %s7005_s2 = inlined_call_operand.hbm [shape: f32[2,256,128], index: 2, kind: output, shape index: {0}]   ;;  %s7006_s3 = inlined_call_operand.hbm [shape: f32[2,2,128], index: 3, kind: output, shape index: {1}]  }
   0x1   :  { %11 = vsyncpa [#allocation3 + $0x1], 0 }
   0x2   :  { %12 = vsyncpa [#allocation5], 0 }
   0x3   :  { %14 = vsyncpa [#allocation5 + $0x1], 0  ;;  %s5408_s12 = smov 0   ;;  %s5410_s13 = smov 0  }
   0x4   :  { %s5412_s14 = smov 0   ;;  %s5414_s15 = smov 0  }
   0x5   :  { %s5416_s16 = smov 0   ;;  %s5418_s17 = smov 0  }
   0x6 LB: > { %s3949_s18 = sadd.s32 4294967295, %s5381_s17   ;;  %s3950_s19 = sadd.s32 4294967294, %s5381_s17   ;;  %s5381_s17 = sphi %s5418_s17, %s20_s17   ;;  %s5377_s16 = sphi %s5416_s16, %s7243_s16   ;;  %s5373_s15 = sphi %s5414_s15, %s7242_s15   ;;  %s5369_s14 = sphi %s5412_s14, %s7241_s14   ;;  %s5365_s13 = sphi %s5410_s13, %s7240_s13   ;;  %s5361_s12 = sphi %s5408_s12, %s7239_s12  }
   0x7   : > { %s32_s20 = sadd.s32 1, %s5377_s16  ;;  %s88_s21 = sadd.s32 1, %s5369_s14 }
   0x8   : > { %p34_p0 = scmp.ge.s32.totalorder %s32_s20, 2  ;;  %p98_p1 = scmp.ne.s32.totalorder %s5369_s14, %s5365_s13 }
   0x9   : > { %p99_p2 = scmp.eq.s32.totalorder %s3949_s18, 1  ;;  %p104_p3 = scmp.ne.s32.totalorder %s5365_s13, %s5361_s12 }
   0xa   : > { %s7245_s20 = smov (%p34_p0, %s32_s20), 0  ;;  %p105_p5 = scmp.eq.s32.totalorder %s3950_s19, 1 }
   0xb   : > { %p5448_p4 = por %p99_p2, %p98_p1  ;;  %s83_s23 = ssub.s32 %s5377_s16, %s7245_s20 }
   0xc   : > { %p3953_p6 = scmp.ge.s32.totalorder %s5381_s17, 1  ;;  %p86_p7 = scmp.eq.s32.totalorder %s83_s23, 0 }
   0xd   : > { %p5455_p8 = por %p105_p5, %p104_p3  ;;  %p160_p9 = scmp.lt.s32.totalorder %s5381_s17, 3 }
   0xe   : > { %s5461_s25 = scalar_select %p86_p7, %s5369_s14, %s88_s21  }
   0xf   : > { %p161_p10 = pnand %p3953_p6, %p160_p9 }
  0x11   : > { %164 = sbr.rel (%p161_p10) target bundleno = 559 (0x22f), region = 28 }
  0x16   : > { %v3957_v0 = vld [vmem:[%s7004_s1 + $0x4] sm:$0xf]  ;;  %vm367_vm0 = vcmask 1043456   ;;  %p189_p11 = scmp.lt.s32.totalorder %s5373_s15, 1  ;;  %v235_v1 = vld [vmem:[%s7004_s1] sm:$0xf] }
  0x17   : > { %5209 = vmatprep.subr.msk.mxu1 %vm367_vm0, %v3957_v0  ;;  %4759 = vmatprep.subr.msk.mxu0 %vm367_vm0, %v3957_v0  ;;  %v4024_v2 = vld [vmem:[%s7004_s1 + $0x8] sm:$0xf]  ;;  %vm270_vm1 = vcmask 31744   ;;  %v5508_v9 = vld [vmem:[%s7004_s1 + $0xc] sm:$0xf]  ;;  %s4461_s10 = sshll.u32 %s5373_s15, 12 }
  0x18   : > { %5210 = vmatpush3.msk.msra.mxu1 %vm367_vm0, %v3957_v0  ;;  %4760 = vmatpush3.msk.msra.mxu0 %vm367_vm0, %v3957_v0  ;;  %s190_s5 = scalar_select %p189_p11, %s5373_s15, 1  ;;  %v5513_v10 = vld [vmem:[%s7004_s1 + $0x10] sm:$0xf]  ;;  %v5672_v43 = vld [vmem:[%s7004_s1 + $0x14] sm:$0xf] }
  0x19   : > { %4809 = vmatprep.subr.msk.mxu1 %vm367_vm0, %v235_v1  ;;  %4859 = vmatprep.subr.msk.mxu0 %vm367_vm0, %v4024_v2  ;;  %v5677_v44 = vld [vmem:[%s7004_s1 + $0x18] sm:$0xf]  ;;  %s6930_s21 = scalar_lea.hbm %s7005_s2, %s4461_s10  ;;  %s5384_s27 = smov [#allocation2]  }
  0x1a   : > { %s5211_s6 = smul.u32 432, %s190_s5  ;;  %s6682_s5 = sand.u32 1, %s5365_s13  }
  0x1b   : > { %s3954_s8 = sshll.u32 %s6682_s5, 8  ;;  %s3801_s23 = scalar_lea.sflag [#allocation3], %s6682_s5 }
  0x1c   : > { %s5483_s9 = scalar_lea.vmem %s7003_s0, %s5211_s6  ;;  %s3955_s6 = sshll.u32 %s6682_s5, 1 }
  0x1d   : > { %v236_v3 = vld [vmem:[%s5483_s9 + $0x1] sm:$0xff]  ;;  %v237_v5 = vld [vmem:[%s5483_s9 + $0x9] sm:$0xff]  ;;  %v5497_v7 = vld [vmem:[%s5483_s9 + $0x19] sm:$0xff]  ;;  %s6693_s7 = scalar_lea.vmem [#allocation4], %s3955_s6  ;;  %s5279_s28 = sshll.u32 %s5384_s27, 4  ;;  %s5280_s28 = int_to_ptr.vmem [resolvable:$false] %s5279_s28 }
  0x1e   : > { %v5487_v4 = vld [vmem:[%s5483_s9 + $0xc1] sm:$0xff]  ;;  %4761 = vmatprep.mubr.msk.f32.mxu0 %vm270_vm1, %v236_v3  ;;  %v5494_v6 = vld [vmem:[%s5483_s9 + $0xc9] sm:$0xff]  ;;  %v5500_v8 = vld [vmem:[%s5483_s9 + $0xd9] sm:$0xff]  ;;  %s5281_s29 = scalar_lea.vmem %s5280_s28, 8192 }
  0x1f   : > { %4785 = vmatprep.mubr.msk.f32.mxu1 %vm270_vm1, %v5487_v4  ;;  %4762 = vmatmul.mubr.msk.f32.vlgmr.msra.gmra.mxu0 %vm270_vm1, %v237_v5  ;;  %v5518_v11 = vld [vmem:[%s5483_s9 + $0x21] sm:$0xff]  ;;  %v5528_v13 = vld [vmem:[%s5483_s9 + $0x31] sm:$0xff]  ;;  %v5546_v15 = vld [vmem:[%s5483_s9 + $0x39] sm:$0xff] }
  0x20   : > { %4786 = vmatmul.mubr.msk.f32.vlgmr.msra.gmra.mxu1 %vm270_vm1, %v5494_v6  ;;  %4860 = vmatpush3.msk.msra.mxu0 %vm367_vm0, %v4024_v2  ;;  %v5521_v12 = vld [vmem:[%s5483_s9 + $0xe1] sm:$0xff]  ;;  %v5531_v14 = vld [vmem:[%s5483_s9 + $0xf1] sm:$0xff]  ;;  %v5549_v16 = vld [vmem:[%s5483_s9 + $0xf9] sm:$0xff] }
  0x21   : > { %4810 = vmatpush3.msk.msra.mxu1 %vm367_vm0, %v235_v1  ;;  %4764 = vmatprep.mubr.msk.f32.mxu0 %vm270_vm1, %v5497_v7  ;;  %v5552_v17 = vld [vmem:[%s5483_s9 + $0x49] sm:$0xff]  ;;  %v5566_v19 = vld [vmem:[%s5483_s9 + $0x51] sm:$0xff]  ;;  %v5572_v21 = vld [vmem:[%s5483_s9 + $0x61] sm:$0xff] }
  0x22   : > { %4788 = vmatprep.mubr.msk.f32.mxu1 %vm270_vm1, %v5500_v8  ;;  %4909 = vmatprep.subr.msk.mxu1 %vm367_vm0, %v5508_v9  ;;  %v5555_v18 = vld [vmem:[%s5483_s9 + $0x109] sm:$0xff]  ;;  %v5569_v20 = vld [vmem:[%s5483_s9 + $0x111] sm:$0xff]  ;;  %v5575_v22 = vld [vmem:[%s5483_s9 + $0x121] sm:$0xff] }
  0x23   : > { %4959 = vmatprep.subr.msk.mxu0 %vm367_vm0, %v5513_v10  ;;  %4765 = vmatmul.mubr.msk.f32.gmra.mxu0 %vm270_vm1, %v5518_v11  ;;  %v5586_v23 = vld [vmem:[%s5483_s9 + $0x69] sm:$0xff]  ;;  %v5592_v25 = vld [vmem:[%s5483_s9 + $0x79] sm:$0xff]  ;;  %v5606_v27 = vld [vmem:[%s5483_s9 + $0x81] sm:$0xff] }
  0x24   : > { %4789 = vmatmul.mubr.msk.f32.gmra.mxu1 %vm270_vm1, %v5521_v12  ;;  %4767 = vmatprep.mubr.msk.f32.mxu0 %vm270_vm1, %v5528_v13  ;;  %v5589_v24 = vld [vmem:[%s5483_s9 + $0x129] sm:$0xff]  ;;  %v5595_v26 = vld [vmem:[%s5483_s9 + $0x139] sm:$0xff]  ;;  %v5609_v28 = vld [vmem:[%s5483_s9 + $0x141] sm:$0xff] }
  0x25   : > { %4791 = vmatprep.mubr.msk.f32.mxu1 %vm270_vm1, %v5531_v14  ;;  %v5612_v29 = vld [vmem:[%s5483_s9 + $0x91] sm:$0xff]  ;;  %v5626_v31 = vld [vmem:[%s5483_s9 + $0x99] sm:$0xff]  ;;  %v5632_v33 = vld [vmem:[%s5483_s9 + $0xa9] sm:$0xff] }
  0x26   : > { %v5615_v30 = vld [vmem:[%s5483_s9 + $0x151] sm:$0xff]  ;;  %v5629_v32 = vld [vmem:[%s5483_s9 + $0x159] sm:$0xff]  ;;  %v5635_v34 = vld [vmem:[%s5483_s9 + $0x169] sm:$0xff] }
  0x27   : > { %4768 = vmatmul.mubr.msk.f32.gmra.mxu0 %vm270_vm1, %v5546_v15  ;;  %v5646_v35 = vld [vmem:[%s5483_s9 + $0xb1] sm:$0xff]  ;;  %v203_v37 = vld [vmem:[%s5483_s9] sm:$0xff]  ;;  %v204_v39 = vld [vmem:[%s5483_s9 + $0x8] sm:$0xff] }
  0x28   : > { %4792 = vmatmul.mubr.msk.f32.gmra.mxu1 %vm270_vm1, %v5549_v16  ;;  %4770 = vmatprep.mubr.msk.f32.mxu0 %vm270_vm1, %v5552_v17  ;;  %v5649_v36 = vld [vmem:[%s5483_s9 + $0x171] sm:$0xff]  ;;  %v920_v38 = vld [vmem:[%s5483_s9 + $0x2] sm:$0xff]  ;;  %v5665_v42 = vld [vmem:[%s5483_s9 + $0x1a] sm:$0xff] }
  0x29   : > { %4794 = vmatprep.mubr.msk.f32.mxu1 %vm270_vm1, %v5555_v18  ;;  %7069 = vst [vmem:[#allocation8_spill] sm:$0xff] %v5649_v36  ;;  %v921_v40 = vld [vmem:[%s5483_s9 + $0xa] sm:$0xff]  ;;  %v5662_v41 = vld [vmem:[%s5483_s9 + $0x18] sm:$0xff]  ;;  %7070 = vst [vmem:[#allocation9_spill] sm:$0xff] %v5665_v42 }
  0x2a   : > { %v5684_v45 = vld [vmem:[%s5483_s9 + $0x20] sm:$0xff]  ;;  %v5694_v47 = vld [vmem:[%s5483_s9 + $0x30] sm:$0xff]  ;;  %v5712_v49 = vld [vmem:[%s5483_s9 + $0x38] sm:$0xff] }
  0x2b   : > { %4771 = vmatmul.mubr.msk.f32.gmra.mxu0 %vm270_vm1, %v5566_v19  ;;  %v5687_v46 = vld [vmem:[%s5483_s9 + $0x22] sm:$0xff]  ;;  %v5697_v48 = vld [vmem:[%s5483_s9 + $0x32] sm:$0xff]  ;;  %v5715_v50 = vld [vmem:[%s5483_s9 + $0x3a] sm:$0xff] }
  0x2c   : > { %4795 = vmatmul.mubr.msk.f32.gmra.mxu1 %vm270_vm1, %v5569_v20  ;;  %4773 = vmatprep.mubr.msk.f32.mxu0 %vm270_vm1, %v5572_v21  ;;  %7071 = vst [vmem:[#allocation10_spill] sm:$0xff] %v5687_v46  ;;  %7072 = vst [vmem:[#allocation11_spill] sm:$0xff] %v5697_v48  ;;  %v5718_v51 = vld [vmem:[%s5483_s9 + $0x48] sm:$0xff]  ;;  %v5732_v53 = vld [vmem:[%s5483_s9 + $0x50] sm:$0xff] }
  0x2d   : > { %4797 = vmatprep.mubr.msk.f32.mxu1 %vm270_vm1, %v5575_v22  ;;  %7073 = vst [vmem:[#allocation12_spill] sm:$0xff] %v5715_v50  ;;  %v5721_v52 = vld [vmem:[%s5483_s9 + $0x4a] sm:$0xff]  ;;  %v5735_v54 = vld [vmem:[%s5483_s9 + $0x52] sm:$0xff]  ;;  %v5738_v55 = vld [vmem:[%s5483_s9 + $0x60] sm:$0xff] }
  0x2e   : > { %7074 = vst [vmem:[#allocation13_spill] sm:$0xff] %v5721_v52  ;;  %7075 = vst [vmem:[#allocation14_spill] sm:$0xff] %v5735_v54  ;;  %v5741_v56 = vld [vmem:[%s5483_s9 + $0x62] sm:$0xff]  ;;  %v5755_v58 = vld [vmem:[%s5483_s9 + $0x6a] sm:$0xff] }
  0x2f   : > { %4774 = vmatmul.mubr.msk.f32.gmra.mxu0 %vm270_vm1, %v5586_v23  ;;  %7076 = vst [vmem:[#allocation15_spill] sm:$0xff] %v5741_v56  ;;  %v5752_v57 = vld [vmem:[%s5483_s9 + $0x68] sm:$0xff]  ;;  %7077 = vst [vmem:[#allocation16_spill] sm:$0xff] %v5755_v58  ;;  %v5758_v59 = vld [vmem:[%s5483_s9 + $0x78] sm:$0xff] }
  0x30   : > { %4798 = vmatmul.mubr.msk.f32.gmra.mxu1 %vm270_vm1, %v5589_v24  ;;  %4776 = vmatprep.mubr.msk.f32.mxu0 %vm270_vm1, %v5592_v25  ;;  %v5761_v60 = vld [vmem:[%s5483_s9 + $0x7a] sm:$0xff]  ;;  %v5775_v62 = vld [vmem:[%s5483_s9 + $0x82] sm:$0xff]  ;;  %v5778_v63 = vld [vmem:[%s5483_s9 + $0x90] sm:$0xff] }
  0x31   : > { %4800 = vmatprep.mubr.msk.f32.mxu1 %vm270_vm1, %v5595_v26  ;;  %7078 = vst [vmem:[#allocation17_spill] sm:$0xff] %v5761_v60  ;;  %v5772_v61 = vld [vmem:[%s5483_s9 + $0x80] sm:$0xff]  ;;  %7079 = vst [vmem:[#allocation18_spill] sm:$0xff] %v5775_v62  ;;  %v5781_v0 = vld [vmem:[%s5483_s9 + $0x92] sm:$0xff] }
  0x32   : > { %7080 = vst [vmem:[#allocation19_spill] sm:$0xff] %v5781_v0  ;;  %v5792_v1 = vld [vmem:[%s5483_s9 + $0x98] sm:$0xff]  ;;  %v5798_v3 = vld [vmem:[%s5483_s9 + $0xa8] sm:$0xff] }
  0x33   : > { %4777 = vmatmul.mubr.msk.f32.gmra.mxu0 %vm270_vm1, %v5606_v27  ;;  %v5795_v2 = vld [vmem:[%s5483_s9 + $0x9a] sm:$0xff]  ;;  %v5801_v5 = vld [vmem:[%s5483_s9 + $0xaa] sm:$0xff] }
  0x34   : > { %4801 = vmatmul.mubr.msk.f32.gmra.mxu1 %vm270_vm1, %v5609_v28  ;;  %4779 = vmatprep.mubr.msk.f32.mxu0 %vm270_vm1, %v5612_v29  ;;  %7081 = vst [vmem:[#allocation20_spill] sm:$0xff] %v5795_v2  ;;  %7082 = vst [vmem:[#allocation21_spill] sm:$0xff] %v5801_v5 }
  0x35   : > { %4803 = vmatprep.mubr.msk.f32.mxu1 %vm270_vm1, %v5615_v30 }
  0x37   : > { %4780 = vmatmul.mubr.msk.f32.gmra.mxu0 %vm270_vm1, %v5626_v31 }
  0x38   : > { %4804 = vmatmul.mubr.msk.f32.gmra.mxu1 %vm270_vm1, %v5629_v32  ;;  %4782 = vmatprep.mubr.msk.f32.mxu0 %vm270_vm1, %v5632_v33 }
  0x39   : > { %4806 = vmatprep.mubr.msk.f32.mxu1 %vm270_vm1, %v5635_v34 }
  0x3b   : > { %4783 = vmatmul.mubr.msk.f32.gmra.mxu0 %vm270_vm1, %v5646_v35 }
  0x3c   : > { %4807 = vmatmul.mubr.msk.f32.gmra.mxu1 %vm270_vm1, %v5649_v36  ;;  %4861 = vmatprep.mubr.msk.f32.mxu0 %vm270_vm1, %v920_v38  ;;  %v5821_v38 = vld [vmem:[%s5483_s9 + $0xc2] sm:$0xff]  ;;  %v5961_v36 = vld [vmem:[%s5483_s9 + $0x16a] sm:$0xff] }
  0x3d   : > { %4811 = vmatprep.mubr.msk.f32.mxu1 %vm270_vm1, %v203_v37  ;;  %v5818_v37 = vld [vmem:[%s5483_s9 + $0xc0] sm:$0xff]  ;;  %7084 = vst [vmem:[#allocation23_spill] sm:$0xff] %v5821_v38  ;;  %7098 = vst [vmem:[#allocation37_spill] sm:$0xff] %v5961_v36 }
  0x3f   : > { %4862 = vmatmul.mubr.msk.f32.vlgmr.msra.gmra.mxu0 %vm270_vm1, %v921_v40  ;;  %v5835_v40 = vld [vmem:[%s5483_s9 + $0xca] sm:$0xff] }
  0x40   : > { %4812 = vmatmul.mubr.msk.f32.vlgmr.msra.gmra.mxu1 %vm270_vm1, %v204_v39  ;;  %4960 = vmatpush3.msk.msra.mxu0 %vm367_vm0, %v5513_v10  ;;  %v5815_v10 = vld [vmem:[%s5483_s9 + $0xb2] sm:$0xff]  ;;  %v5832_v39 = vld [vmem:[%s5483_s9 + $0xc8] sm:$0xff]  ;;  %7085 = vst [vmem:[#allocation24_spill] sm:$0xff] %v5835_v40 }
  0x41   : > { %4910 = vmatpush3.msk.msra.mxu1 %vm367_vm0, %v5508_v9  ;;  %4814 = vmatprep.mubr.msk.f32.mxu1 %vm270_vm1, %v5662_v41  ;;  %v5812_v9 = vld [vmem:[%s5483_s9 + $0xb0] sm:$0xff]  ;;  %7083 = vst [vmem:[#allocation22_spill] sm:$0xff] %v5815_v10 }
  0x42   : > { %4864 = vmatprep.mubr.msk.f32.mxu0 %vm270_vm1, %v5665_v42  ;;  %5009 = vmatprep.subr.msk.mxu1 %vm367_vm0, %v5672_v43  ;;  %v5958_v42 = vld [vmem:[%s5483_s9 + $0x168] sm:$0xff] }
  0x43   : > { %5059 = vmatprep.subr.msk.mxu0 %vm367_vm0, %v5677_v44  ;;  %4865 = vmatmul.mubr.msk.f32.gmra.mxu0 %vm270_vm1, %v5687_v46  ;;  %v5941_v46 = vld [vmem:[%s5483_s9 + $0x152] sm:$0xff] }
  0x44   : > { %4815 = vmatmul.mubr.msk.f32.gmra.mxu1 %vm270_vm1, %v5684_v45  ;;  %4867 = vmatprep.mubr.msk.f32.mxu0 %vm270_vm1, %v5697_v48  ;;  %v5938_v48 = vld [vmem:[%s5483_s9 + $0x150] sm:$0xff]  ;;  %7096 = vst [vmem:[#allocation35_spill] sm:$0xff] %v5941_v46 }
  0x45   : > { %4817 = vmatprep.mubr.msk.f32.mxu1 %vm270_vm1, %v5694_v47 }
  0x47   : > { %4868 = vmatmul.mubr.msk.f32.gmra.mxu0 %vm270_vm1, %v5715_v50  ;;  %v5921_v50 = vld [vmem:[%s5483_s9 + $0x13a] sm:$0xff] }
  0x48   : > { %4818 = vmatmul.mubr.msk.f32.gmra.mxu1 %vm270_vm1, %v5712_v49  ;;  %4870 = vmatprep.mubr.msk.f32.mxu0 %vm270_vm1, %v5721_v52  ;;  %v5918_v52 = vld [vmem:[%s5483_s9 + $0x138] sm:$0xff]  ;;  %7094 = vst [vmem:[#allocation33_spill] sm:$0xff] %v5921_v50 }
  0x49   : > { %4820 = vmatprep.mubr.msk.f32.mxu1 %vm270_vm1, %v5718_v51 }
  0x4b   : > { %4871 = vmatmul.mubr.msk.f32.gmra.mxu0 %vm270_vm1, %v5735_v54  ;;  %v5901_v54 = vld [vmem:[%s5483_s9 + $0x122] sm:$0xff] }
  0x4c   : > { %4821 = vmatmul.mubr.msk.f32.gmra.mxu1 %vm270_vm1, %v5732_v53  ;;  %4873 = vmatprep.mubr.msk.f32.mxu0 %vm270_vm1, %v5741_v56  ;;  %v5898_v56 = vld [vmem:[%s5483_s9 + $0x120] sm:$0xff]  ;;  %7092 = vst [vmem:[#allocation31_spill] sm:$0xff] %v5901_v54 }
  0x4d   : > { %4823 = vmatprep.mubr.msk.f32.mxu1 %vm270_vm1, %v5738_v55 }
  0x4f   : > { %4874 = vmatmul.mubr.msk.f32.gmra.mxu0 %vm270_vm1, %v5755_v58  ;;  %v5881_v58 = vld [vmem:[%s5483_s9 + $0x10a] sm:$0xff] }
  0x50   : > { %4824 = vmatmul.mubr.msk.f32.gmra.mxu1 %vm270_vm1, %v5752_v57  ;;  %4876 = vmatprep.mubr.msk.f32.mxu0 %vm270_vm1, %v5761_v60  ;;  %v5878_v60 = vld [vmem:[%s5483_s9 + $0x108] sm:$0xff]  ;;  %7090 = vst [vmem:[#allocation29_spill] sm:$0xff] %v5881_v58 }
  0x51   : > { %4826 = vmatprep.mubr.msk.f32.mxu1 %vm270_vm1, %v5758_v59 }
  0x53   : > { %4877 = vmatmul.mubr.msk.f32.gmra.mxu0 %vm270_vm1, %v5775_v62  ;;  %v5861_v62 = vld [vmem:[%s5483_s9 + $0xf2] sm:$0xff] }
  0x54   : > { %4827 = vmatmul.mubr.msk.f32.gmra.mxu1 %vm270_vm1, %v5772_v61  ;;  %4879 = vmatprep.mubr.msk.f32.mxu0 %vm270_vm1, %v5781_v0  ;;  %v5858_v0 = vld [vmem:[%s5483_s9 + $0xf0] sm:$0xff]  ;;  %7088 = vst [vmem:[#allocation27_spill] sm:$0xff] %v5861_v62 }
  0x55   : > { %4829 = vmatprep.mubr.msk.f32.mxu1 %vm270_vm1, %v5778_v63 }
  0x57   : > { %4880 = vmatmul.mubr.msk.f32.gmra.mxu0 %vm270_vm1, %v5795_v2  ;;  %v5841_v2 = vld [vmem:[%s5483_s9 + $0xda] sm:$0xff] }
  0x58   : > { %4830 = vmatmul.mubr.msk.f32.gmra.mxu1 %vm270_vm1, %v5792_v1  ;;  %4882 = vmatprep.mubr.msk.f32.mxu0 %vm270_vm1, %v5801_v5  ;;  %v5838_v5 = vld [vmem:[%s5483_s9 + $0xd8] sm:$0xff]  ;;  %7086 = vst [vmem:[#allocation25_spill] sm:$0xff] %v5841_v2 }
  0x59   : > { %4832 = vmatprep.mubr.msk.f32.mxu1 %vm270_vm1, %v5798_v3 }
  0x5b   : > { %4883 = vmatmul.mubr.msk.f32.gmra.mxu0 %vm270_vm1, %v5815_v10  ;;  %v5855_v10 = vld [vmem:[%s5483_s9 + $0xe2] sm:$0xff] }
  0x5c   : > { %4833 = vmatmul.mubr.msk.f32.gmra.mxu1 %vm270_vm1, %v5812_v9  ;;  %4885 = vmatprep.mubr.msk.f32.mxu0 %vm270_vm1, %v5821_v38  ;;  %v5852_v38 = vld [vmem:[%s5483_s9 + $0xe0] sm:$0xff]  ;;  %7087 = vst [vmem:[#allocation26_spill] sm:$0xff] %v5855_v10 }
  0x5d   : > { %4835 = vmatprep.mubr.msk.f32.mxu1 %vm270_vm1, %v5818_v37 }
  0x5f   : > { %4886 = vmatmul.mubr.msk.f32.gmra.mxu0 %vm270_vm1, %v5835_v40  ;;  %v5875_v40 = vld [vmem:[%s5483_s9 + $0xfa] sm:$0xff] }
  0x60   : > { %4836 = vmatmul.mubr.msk.f32.gmra.mxu1 %vm270_vm1, %v5832_v39  ;;  %4888 = vmatprep.mubr.msk.f32.mxu0 %vm270_vm1, %v5841_v2  ;;  %v5872_v2 = vld [vmem:[%s5483_s9 + $0xf8] sm:$0xff]  ;;  %7089 = vst [vmem:[#allocation28_spill] sm:$0xff] %v5875_v40 }
  0x61   : > { %4838 = vmatprep.mubr.msk.f32.mxu1 %vm270_vm1, %v5838_v5 }
  0x63   : > { %4889 = vmatmul.mubr.msk.f32.gmra.mxu0 %vm270_vm1, %v5855_v10  ;;  %v5895_v10 = vld [vmem:[%s5483_s9 + $0x112] sm:$0xff] }
  0x64   : > { %4839 = vmatmul.mubr.msk.f32.gmra.mxu1 %vm270_vm1, %v5852_v38  ;;  %4891 = vmatprep.mubr.msk.f32.mxu0 %vm270_vm1, %v5861_v62  ;;  %v5892_v62 = vld [vmem:[%s5483_s9 + $0x110] sm:$0xff]  ;;  %7091 = vst [vmem:[#allocation30_spill] sm:$0xff] %v5895_v10 }
  0x65   : > { %4841 = vmatprep.mubr.msk.f32.mxu1 %vm270_vm1, %v5858_v0 }
  0x67   : > { %4892 = vmatmul.mubr.msk.f32.gmra.mxu0 %vm270_vm1, %v5875_v40  ;;  %v5915_v40 = vld [vmem:[%s5483_s9 + $0x12a] sm:$0xff] }
  0x68   : > { %4842 = vmatmul.mubr.msk.f32.gmra.mxu1 %vm270_vm1, %v5872_v2  ;;  %4894 = vmatprep.mubr.msk.f32.mxu0 %vm270_vm1, %v5881_v58  ;;  %v5912_v58 = vld [vmem:[%s5483_s9 + $0x128] sm:$0xff]  ;;  %7093 = vst [vmem:[#allocation32_spill] sm:$0xff] %v5915_v40 }
  0x69   : > { %4844 = vmatprep.mubr.msk.f32.mxu1 %vm270_vm1, %v5878_v60 }
  0x6b   : > { %4895 = vmatmul.mubr.msk.f32.gmra.mxu0 %vm270_vm1, %v5895_v10  ;;  %v5935_v10 = vld [vmem:[%s5483_s9 + $0x142] sm:$0xff] }
  0x6c   : > { %4845 = vmatmul.mubr.msk.f32.gmra.mxu1 %vm270_vm1, %v5892_v62  ;;  %4897 = vmatprep.mubr.msk.f32.mxu0 %vm270_vm1, %v5901_v54  ;;  %v5932_v54 = vld [vmem:[%s5483_s9 + $0x140] sm:$0xff]  ;;  %7095 = vst [vmem:[#allocation34_spill] sm:$0xff] %v5935_v10 }
  0x6d   : > { %4847 = vmatprep.mubr.msk.f32.mxu1 %vm270_vm1, %v5898_v56 }
  0x6f   : > { %4898 = vmatmul.mubr.msk.f32.gmra.mxu0 %vm270_vm1, %v5915_v40  ;;  %v5955_v40 = vld [vmem:[%s5483_s9 + $0x15a] sm:$0xff] }
  0x70   : > { %4848 = vmatmul.mubr.msk.f32.gmra.mxu1 %vm270_vm1, %v5912_v58  ;;  %4900 = vmatprep.mubr.msk.f32.mxu0 %vm270_vm1, %v5921_v50  ;;  %v5952_v50 = vld [vmem:[%s5483_s9 + $0x158] sm:$0xff]  ;;  %7097 = vst [vmem:[#allocation36_spill] sm:$0xff] %v5955_v40 }
  0x71   : > { %4850 = vmatprep.mubr.msk.f32.mxu1 %vm270_vm1, %v5918_v52 }
  0x73   : > { %4901 = vmatmul.mubr.msk.f32.gmra.mxu0 %vm270_vm1, %v5935_v10  ;;  %v5975_v10 = vld [vmem:[%s5483_s9 + $0x172] sm:$0xff] }
  0x74   : > { %4851 = vmatmul.mubr.msk.f32.gmra.mxu1 %vm270_vm1, %v5932_v54  ;;  %4903 = vmatprep.mubr.msk.f32.mxu0 %vm270_vm1, %v5941_v46  ;;  %v5972_v46 = vld [vmem:[%s5483_s9 + $0x170] sm:$0xff]  ;;  %7099 = vst [vmem:[#allocation38_spill] sm:$0xff] %v5975_v10 }
  0x75   : > { %4853 = vmatprep.mubr.msk.f32.mxu1 %vm270_vm1, %v5938_v48 }
  0x77   : > { %4904 = vmatmul.mubr.msk.f32.gmra.mxu0 %vm270_vm1, %v5955_v40 }
  0x78   : > { %4854 = vmatmul.mubr.msk.f32.gmra.mxu1 %vm270_vm1, %v5952_v50  ;;  %4906 = vmatprep.mubr.msk.f32.mxu0 %vm270_vm1, %v5961_v36  ;;  %v5992_v36 = vld [vmem:[%s7004_s1 + $0x1c] sm:$0xf] }
  0x79   : > { %4856 = vmatprep.mubr.msk.f32.mxu1 %vm270_vm1, %v5958_v42 }
  0x7b   : > { %4907 = vmatmul.mubr.msk.f32.gmra.mxu0 %vm270_vm1, %v5975_v10  ;;  %v5997_v10 = vld [vmem:[%s7004_s1 + $0x20] sm:$0xf] }
  0x7c   : > { %4857 = vmatmul.mubr.msk.f32.gmra.mxu1 %vm270_vm1, %v5972_v46  ;;  %4961 = vmatprep.mubr.msk.f32.mxu0 %vm270_vm1, %v5497_v7  ;;  %v7101_v7 = vld [vmem:[#allocation8_spill] sm:$0xff] }
  0x7d   : > { %4911 = vmatprep.mubr.msk.f32.mxu1 %vm270_vm1, %v5662_v41 }
  0x7f   : > { %4962 = vmatmul.mubr.msk.f32.vlgmr.msra.gmra.mxu0 %vm270_vm1, %v5518_v11  ;;  %v6133_v11 = vld [vmem:[%s5483_s9 + $0x189] sm:$0xff] }
  0x80   : > { %4912 = vmatmul.mubr.msk.f32.vlgmr.msra.gmra.mxu1 %vm270_vm1, %v5684_v45  ;;  %5060 = vmatpush3.msk.msra.mxu0 %vm367_vm0, %v5677_v44  ;;  %7102 = vst [vmem:[#allocation8_spill] sm:$0xff] %v6133_v11  ;;  %v7120_v44 = vld [vmem:[#allocation26_spill] sm:$0xff]  ;;  %v7121_v45 = vld [vmem:[#allocation27_spill] sm:$0xff] }
  0x81   : > { %5010 = vmatpush3.msk.msra.mxu1 %vm367_vm0, %v5672_v43  ;;  %4914 = vmatprep.mubr.msk.f32.mxu1 %vm270_vm1, %v5694_v47 }
  0x82   : > { %4964 = vmatprep.mubr.msk.f32.mxu0 %vm270_vm1, %v5528_v13  ;;  %5109 = vmatprep.subr.msk.mxu1 %vm367_vm0, %v5992_v36 }
  0x83   : > { %5159 = vmatprep.subr.msk.mxu0 %vm367_vm0, %v5997_v10  ;;  %4965 = vmatmul.mubr.msk.f32.gmra.mxu0 %vm270_vm1, %v5546_v15 }
  0x84   : > { %4915 = vmatmul.mubr.msk.f32.gmra.mxu1 %vm270_vm1, %v5712_v49  ;;  %4967 = vmatprep.mubr.msk.f32.mxu0 %vm270_vm1, %v5552_v17 }
  0x85   : > { %4917 = vmatprep.mubr.msk.f32.mxu1 %vm270_vm1, %v5718_v51 }
  0x87   : > { %4968 = vmatmul.mubr.msk.f32.gmra.mxu0 %vm270_vm1, %v5566_v19 }
  0x88   : > { %4918 = vmatmul.mubr.msk.f32.gmra.mxu1 %vm270_vm1, %v5732_v53  ;;  %4970 = vmatprep.mubr.msk.f32.mxu0 %vm270_vm1, %v5572_v21 }
  0x89   : > { %4920 = vmatprep.mubr.msk.f32.mxu1 %vm270_vm1, %v5738_v55 }
  0x8b   : > { %4971 = vmatmul.mubr.msk.f32.gmra.mxu0 %vm270_vm1, %v5586_v23 }
  0x8c   : > { %4921 = vmatmul.mubr.msk.f32.gmra.mxu1 %vm270_vm1, %v5752_v57  ;;  %4973 = vmatprep.mubr.msk.f32.mxu0 %vm270_vm1, %v5592_v25 }
  0x8d   : > { %4923 = vmatprep.mubr.msk.f32.mxu1 %vm270_vm1, %v5758_v59 }
  0x8f   : > { %4974 = vmatmul.mubr.msk.f32.gmra.mxu0 %vm270_vm1, %v5606_v27 }
  0x90   : > { %4924 = vmatmul.mubr.msk.f32.gmra.mxu1 %vm270_vm1, %v5772_v61  ;;  %4976 = vmatprep.mubr.msk.f32.mxu0 %vm270_vm1, %v5612_v29  ;;  %v7112_v29 = vld [vmem:[#allocation18_spill] sm:$0xff] }
  0x91   : > { %4926 = vmatprep.mubr.msk.f32.mxu1 %vm270_vm1, %v5778_v63 }
  0x93   : > { %4977 = vmatmul.mubr.msk.f32.gmra.mxu0 %vm270_vm1, %v5626_v31  ;;  %v7114_v31 = vld [vmem:[#allocation20_spill] sm:$0xff] }
  0x94   : > { %4927 = vmatmul.mubr.msk.f32.gmra.mxu1 %vm270_vm1, %v5792_v1  ;;  %4979 = vmatprep.mubr.msk.f32.mxu0 %vm270_vm1, %v5632_v33  ;;  %v7116_v33 = vld [vmem:[#allocation22_spill] sm:$0xff] }
  0x95   : > { %4929 = vmatprep.mubr.msk.f32.mxu1 %vm270_vm1, %v5798_v3 }
  0x97   : > { %4980 = vmatmul.mubr.msk.f32.gmra.mxu0 %vm270_vm1, %v5646_v35  ;;  %v7118_v35 = vld [vmem:[#allocation24_spill] sm:$0xff] }
  0x98   : > { %4930 = vmatmul.mubr.msk.f32.gmra.mxu1 %vm270_vm1, %v5812_v9  ;;  %4982 = vmatprep.mubr.msk.f32.mxu0 %vm270_vm1, %v5487_v4  ;;  %v6116_v4 = vld [vmem:[%s5483_s9 + $0x180] sm:$0xff] }
  0x99   : > { %4932 = vmatprep.mubr.msk.f32.mxu1 %vm270_vm1, %v5818_v37 }
  0x9b   : > { %4983 = vmatmul.mubr.msk.f32.gmra.mxu0 %vm270_vm1, %v5494_v6  ;;  %v6119_v6 = vld [vmem:[%s5483_s9 + $0x181] sm:$0xff] }
  0x9c   : > { %4933 = vmatmul.mubr.msk.f32.gmra.mxu1 %vm270_vm1, %v5832_v39  ;;  %4985 = vmatprep.mubr.msk.f32.mxu0 %vm270_vm1, %v5500_v8  ;;  %7100 = vst [vmem:[#allocation39_spill] sm:$0xff] %v6119_v6  ;;  %v6130_v8 = vld [vmem:[%s5483_s9 + $0x188] sm:$0xff] }
  0x9d   : > { %4935 = vmatprep.mubr.msk.f32.mxu1 %vm270_vm1, %v5838_v5 }
  0x9f   : > { %4986 = vmatmul.mubr.msk.f32.gmra.mxu0 %vm270_vm1, %v5521_v12  ;;  %v7103_v12 = vld [vmem:[#allocation9_spill] sm:$0xff] }
  0xa0   : > { %4936 = vmatmul.mubr.msk.f32.gmra.mxu1 %vm270_vm1, %v5852_v38  ;;  %4988 = vmatprep.mubr.msk.f32.mxu0 %vm270_vm1, %v5531_v14  ;;  %v7104_v14 = vld [vmem:[#allocation10_spill] sm:$0xff] }
  0xa1   : > { %4938 = vmatprep.mubr.msk.f32.mxu1 %vm270_vm1, %v5858_v0 }
  0xa3   : > { %4989 = vmatmul.mubr.msk.f32.gmra.mxu0 %vm270_vm1, %v5549_v16  ;;  %v7105_v16 = vld [vmem:[#allocation11_spill] sm:$0xff] }
  0xa4   : > { %4939 = vmatmul.mubr.msk.f32.gmra.mxu1 %vm270_vm1, %v5872_v2  ;;  %4991 = vmatprep.mubr.msk.f32.mxu0 %vm270_vm1, %v5555_v18  ;;  %v7106_v18 = vld [vmem:[#allocation12_spill] sm:$0xff] }
  0xa5   : > { %4941 = vmatprep.mubr.msk.f32.mxu1 %vm270_vm1, %v5878_v60 }
  0xa7   : > { %4992 = vmatmul.mubr.msk.f32.gmra.mxu0 %vm270_vm1, %v5569_v20  ;;  %v7107_v20 = vld [vmem:[#allocation13_spill] sm:$0xff] }
  0xa8   : > { %4942 = vmatmul.mubr.msk.f32.gmra.mxu1 %vm270_vm1, %v5892_v62  ;;  %4994 = vmatprep.mubr.msk.f32.mxu0 %vm270_vm1, %v5575_v22  ;;  %v7108_v22 = vld [vmem:[#allocation14_spill] sm:$0xff] }
  0xa9   : > { %4944 = vmatprep.mubr.msk.f32.mxu1 %vm270_vm1, %v5898_v56 }
  0xab   : > { %4995 = vmatmul.mubr.msk.f32.gmra.mxu0 %vm270_vm1, %v5589_v24  ;;  %v7109_v24 = vld [vmem:[#allocation15_spill] sm:$0xff] }
  0xac   : > { %4945 = vmatmul.mubr.msk.f32.gmra.mxu1 %vm270_vm1, %v5912_v58  ;;  %4997 = vmatprep.mubr.msk.f32.mxu0 %vm270_vm1, %v5595_v26  ;;  %v7110_v26 = vld [vmem:[#allocation16_spill] sm:$0xff] }
  0xad   : > { %4947 = vmatprep.mubr.msk.f32.mxu1 %vm270_vm1, %v5918_v52 }
  0xaf   : > { %4998 = vmatmul.mubr.msk.f32.gmra.mxu0 %vm270_vm1, %v5609_v28  ;;  %v7111_v28 = vld [vmem:[#allocation17_spill] sm:$0xff] }
  0xb0   : > { %4948 = vmatmul.mubr.msk.f32.gmra.mxu1 %vm270_vm1, %v5932_v54  ;;  %5000 = vmatprep.mubr.msk.f32.mxu0 %vm270_vm1, %v5615_v30  ;;  %v7113_v30 = vld [vmem:[#allocation19_spill] sm:$0xff] }
  0xb1   : > { %4950 = vmatprep.mubr.msk.f32.mxu1 %vm270_vm1, %v5938_v48 }
  0xb3   : > { %5001 = vmatmul.mubr.msk.f32.gmra.mxu0 %vm270_vm1, %v5629_v32  ;;  %v7115_v32 = vld [vmem:[#allocation21_spill] sm:$0xff] }
  0xb4   : > { %4951 = vmatmul.mubr.msk.f32.gmra.mxu1 %vm270_vm1, %v5952_v50  ;;  %5003 = vmatprep.mubr.msk.f32.mxu0 %vm270_vm1, %v5635_v34  ;;  %v7117_v34 = vld [vmem:[#allocation23_spill] sm:$0xff] }
  0xb5   : > { %4953 = vmatprep.mubr.msk.f32.mxu1 %vm270_vm1, %v5958_v42 }
  0xb7   : > { %5004 = vmatmul.mubr.msk.f32.gmra.mxu0 %vm270_vm1, %v7101_v7 }
  0xb8   : > { %4954 = vmatmul.mubr.msk.f32.gmra.mxu1 %vm270_vm1, %v5972_v46  ;;  %5006 = vmatprep.mubr.msk.f32.mxu0 %vm270_vm1, %v6119_v6  ;;  %v4286_v6 = vld [vmem:[%s5483_s9 + $0x198] sm:$0xff] }
  0xb9   : > { %4956 = vmatprep.mubr.msk.f32.mxu1 %vm270_vm1, %v6116_v4 }
  0xbb   : > { %5007 = vmatmul.mubr.msk.f32.gmra.mxu0 %vm270_vm1, %v6133_v11  ;;  %v6308_v11 = vld [vmem:[%s5483_s9 + $0x182] sm:$0xff] }
  0xbc   : > { %4957 = vmatmul.mubr.msk.f32.gmra.mxu1 %vm270_vm1, %v6130_v8  ;;  %5061 = vmatprep.mubr.msk.f32.mxu0 %vm270_vm1, %v5694_v47  ;;  %7135 = vst [vmem:[#allocation13_spill] sm:$0xff] %v6308_v11 }
  0xbd   : > { %5011 = vmatprep.mubr.msk.f32.mxu1 %vm270_vm1, %v7103_v12 }
  0xbf   : > { %5062 = vmatmul.mubr.msk.f32.vlgmr.msra.gmra.mxu0 %vm270_vm1, %v5712_v49 }
  0xc0   : > { %5012 = vmatmul.mubr.msk.f32.vlgmr.msra.gmra.mxu1 %vm270_vm1, %v7104_v14  ;;  %5160 = vmatpush3.msk.msra.mxu0 %vm367_vm0, %v5997_v10 }
  0xc1   : > { %5110 = vmatpush3.msk.msra.mxu1 %vm367_vm0, %v5992_v36  ;;  %5014 = vmatprep.mubr.msk.f32.mxu1 %vm270_vm1, %v7105_v16  ;;  %v7119_v36 = vld [vmem:[#allocation25_spill] sm:$0xff] }
  0xc2   : > { %5064 = vmatprep.mubr.msk.f32.mxu0 %vm270_vm1, %v5718_v51 }
  0xc3   : > { %5065 = vmatmul.mubr.msk.f32.gmra.mxu0 %vm270_vm1, %v5732_v53 }
  0xc4   : > { %5015 = vmatmul.mubr.msk.f32.gmra.mxu1 %vm270_vm1, %v7106_v18  ;;  %5067 = vmatprep.mubr.msk.f32.mxu0 %vm270_vm1, %v5738_v55  ;;  %v7122_v55 = vld [vmem:[#allocation28_spill] sm:$0xff] }
  0xc5   : > { %5017 = vmatprep.mubr.msk.f32.mxu1 %vm270_vm1, %v7107_v20 }
  0xc7   : > { %5068 = vmatmul.mubr.msk.f32.gmra.mxu0 %vm270_vm1, %v5752_v57  ;;  %v7123_v57 = vld [vmem:[#allocation29_spill] sm:$0xff] }
  0xc8   : > { %5018 = vmatmul.mubr.msk.f32.gmra.mxu1 %vm270_vm1, %v7108_v22  ;;  %5070 = vmatprep.mubr.msk.f32.mxu0 %vm270_vm1, %v5758_v59 }
  0xc9   : > { %5020 = vmatprep.mubr.msk.f32.mxu1 %vm270_vm1, %v7109_v24 }
  0xcb   : > { %5071 = vmatmul.mubr.msk.f32.gmra.mxu0 %vm270_vm1, %v5772_v61 }
  0xcc   : > { %5021 = vmatmul.mubr.msk.f32.gmra.mxu1 %vm270_vm1, %v7110_v26  ;;  %5073 = vmatprep.mubr.msk.f32.mxu0 %vm270_vm1, %v5778_v63 }
  0xcd   : > { %5023 = vmatprep.mubr.msk.f32.mxu1 %vm270_vm1, %v7111_v28 }
  0xcf   : > { %5074 = vmatmul.mubr.msk.f32.gmra.mxu0 %vm270_vm1, %v5792_v1 }
  0xd0   : > { %5024 = vmatmul.mubr.msk.f32.gmra.mxu1 %vm270_vm1, %v7112_v29  ;;  %5076 = vmatprep.mubr.msk.f32.mxu0 %vm270_vm1, %v5798_v3 }
  0xd1   : > { %5026 = vmatprep.mubr.msk.f32.mxu1 %vm270_vm1, %v7113_v30 }
  0xd3   : > { %5077 = vmatmul.mubr.msk.f32.gmra.mxu0 %vm270_vm1, %v5812_v9 }
  0xd4   : > { %5027 = vmatmul.mubr.msk.f32.gmra.mxu1 %vm270_vm1, %v7114_v31  ;;  %5079 = vmatprep.mubr.msk.f32.mxu0 %vm270_vm1, %v5818_v37 }
  0xd5   : > { %5029 = vmatprep.mubr.msk.f32.mxu1 %vm270_vm1, %v7115_v32 }
  0xd7   : > { %5080 = vmatmul.mubr.msk.f32.gmra.mxu0 %vm270_vm1, %v5832_v39 }
  0xd8   : > { %5030 = vmatmul.mubr.msk.f32.gmra.mxu1 %vm270_vm1, %v7116_v33  ;;  %5082 = vmatprep.mubr.msk.f32.mxu0 %vm270_vm1, %v5838_v5  ;;  %v7126_v5 = vld [vmem:[#allocation32_spill] sm:$0xff] }
  0xd9   : > { %5032 = vmatprep.mubr.msk.f32.mxu1 %vm270_vm1, %v7117_v34 }
  0xdb   : > { %5083 = vmatmul.mubr.msk.f32.gmra.mxu0 %vm270_vm1, %v5852_v38  ;;  %v7129_v38 = vld [vmem:[#allocation34_spill] sm:$0xff] }
  0xdc   : > { %5033 = vmatmul.mubr.msk.f32.gmra.mxu1 %vm270_vm1, %v7118_v35  ;;  %5085 = vmatprep.mubr.msk.f32.mxu0 %vm270_vm1, %v5858_v0  ;;  %v7124_v0 = vld [vmem:[#allocation30_spill] sm:$0xff] }
  0xdd   : > { %5035 = vmatprep.mubr.msk.f32.mxu1 %vm270_vm1, %v7119_v36 }
  0xdf   : > { %v6211_v41 = vpop.f32.mrf.mxu0  ;;  %5086 = vmatmul.mubr.msk.f32.gmra.mxu0 %vm270_vm1, %v5872_v2 }
  0xe0   : > { %v6213_v43 = vpop.f32.mrf.mxu1  ;;  %5036 = vmatmul.mubr.msk.f32.gmra.mxu1 %vm270_vm1, %v7120_v44  ;;  %5088 = vmatprep.mubr.msk.f32.mxu0 %vm270_vm1, %v5878_v60 }
  0xe1   : > { %5038 = vmatprep.mubr.msk.f32.mxu1 %vm270_vm1, %v7121_v45  ;;  %v6223_v47 = vpop.f32.mrf.mxu0 }
  0xe2   : > { %v6225_v49 = vpop.f32.mrf.mxu1 }
  0xe3   : > { %v6227_v51 = vpop.f32.mrf.mxu0  ;;  %5089 = vmatmul.mubr.msk.f32.gmra.mxu0 %vm270_vm1, %v5892_v62  ;;  %v7125_v62 = vld [vmem:[#allocation31_spill] sm:$0xff] }
  0xe4   : > { %v6229_v53 = vpop.f32.mrf.mxu1  ;;  %5039 = vmatmul.mubr.msk.f32.gmra.mxu1 %vm270_vm1, %v7122_v55  ;;  %5091 = vmatprep.mubr.msk.f32.mxu0 %vm270_vm1, %v5898_v56 }
  0xe5   : > { %5041 = vmatprep.mubr.msk.f32.mxu1 %vm270_vm1, %v7123_v57  ;;  %v6239_v59 = vpop.f32.mrf.mxu0 }
  0xe6   : > { %v6241_v60 = vpop.f32.mrf.mxu1 }
  0xe7   : > { %v6243_v61 = vpop.f32.mrf.mxu0  ;;  %5092 = vmatmul.mubr.msk.f32.gmra.mxu0 %vm270_vm1, %v5912_v58  ;;  %v7127_v58 = vld [vmem:[#allocation33_spill] sm:$0xff] }
  0xe8   : > { %v6245_v63 = vpop.f32.mrf.mxu1  ;;  %5042 = vmatmul.mubr.msk.f32.gmra.mxu1 %vm270_vm1, %v7124_v0  ;;  %5094 = vmatprep.mubr.msk.f32.mxu0 %vm270_vm1, %v5918_v52 }
  0xe9   : > { %5044 = vmatprep.mubr.msk.f32.mxu1 %vm270_vm1, %v7125_v62  ;;  %v6255_v56 = vpop.f32.mrf.mxu0 }
  0xea   : > { %v6257_v1 = vpop.f32.mrf.mxu1 }
  0xeb   : > { %v6259_v2 = vpop.f32.mrf.mxu0  ;;  %5095 = vmatmul.mubr.msk.f32.gmra.mxu0 %vm270_vm1, %v5932_v54  ;;  %v7130_v54 = vld [vmem:[#allocation35_spill] sm:$0xff] }
  0xec   : > { %v6261_v3 = vpop.f32.mrf.mxu1  ;;  %5045 = vmatmul.mubr.msk.f32.gmra.mxu1 %vm270_vm1, %v7126_v5  ;;  %5097 = vmatprep.mubr.msk.f32.mxu0 %vm270_vm1, %v5938_v48 }
  0xed   : > { %5047 = vmatprep.mubr.msk.f32.mxu1 %vm270_vm1, %v7127_v58  ;;  %v6271_v52 = vpop.f32.mrf.mxu0 }
  0xee   : > { %v6273_v9 = vpop.f32.mrf.mxu1 }
  0xef   : > { %v6275_v10 = vpop.f32.mrf.mxu0  ;;  %5098 = vmatmul.mubr.msk.f32.gmra.mxu0 %vm270_vm1, %v5952_v50  ;;  %v7133_v50 = vld [vmem:[#allocation37_spill] sm:$0xff] }
  0xf0   : > { %v6277_v37 = vpop.f32.mrf.mxu1  ;;  %5048 = vmatmul.mubr.msk.f32.gmra.mxu1 %vm270_vm1, %v7129_v38  ;;  %5100 = vmatprep.mubr.msk.f32.mxu0 %vm270_vm1, %v5958_v42 }
  0xf1   : > { %7128 = vst [vmem:[#allocation9_spill] sm:$0xff] %v6277_v37  ;;  %5050 = vmatprep.mubr.msk.f32.mxu1 %vm270_vm1, %v7130_v54  ;;  %v6287_v48 = vpop.f32.mrf.mxu0  ;;  %v7137_v37 = vld [vmem:[#allocation38_spill] sm:$0xff] }
  0xf2   : > { %v6289_v39 = vpop.f32.mrf.mxu1 }
  0xf3   : > { %7131 = vst [vmem:[#allocation10_spill] sm:$0xff] %v6289_v39  ;;  %v6291_v7 = vpop.f32.mrf.mxu0  ;;  %5101 = vmatmul.mubr.msk.f32.gmra.mxu0 %vm270_vm1, %v5972_v46  ;;  %v6323_v46 = vld [vmem:[%s5483_s9 + $0x18a] sm:$0xff] }
  0xf4   : > { %v6293_v12 = vpop.f32.mrf.mxu1  ;;  %5051 = vmatmul.mubr.msk.f32.gmra.mxu1 %vm270_vm1, %v5955_v40  ;;  %5103 = vmatprep.mubr.msk.f32.mxu0 %vm270_vm1, %v6116_v4  ;;  %7138 = vst [vmem:[#allocation15_spill] sm:$0xff] %v6323_v46  ;;  %v4287_v4 = vld [vmem:[%s5483_s9 + $0x1a0] sm:$0xff] }
  0xf5   : > { %7132 = vst [vmem:[#allocation11_spill] sm:$0xff] %v6293_v12  ;;  %5053 = vmatprep.mubr.msk.f32.mxu1 %vm270_vm1, %v7133_v50  ;;  %v6303_v42 = vpop.f32.mrf.mxu0 }
  0xf6   : > { %v6305_v14 = vpop.f32.mrf.mxu1 }
  0xf7   : > { %7134 = vst [vmem:[#allocation12_spill] sm:$0xff] %v6305_v14  ;;  %v6311_v12 = vpop.f32.mrf.mxu0  ;;  %5104 = vmatmul.mubr.msk.f32.gmra.mxu0 %vm270_vm1, %v6130_v8 }
  0xf8   : > { %v6313_v39 = vpop.f32.mrf.mxu1  ;;  %5054 = vmatmul.mubr.msk.f32.gmra.mxu1 %vm270_vm1, %v7137_v37  ;;  %5106 = vmatprep.mubr.msk.f32.mxu0 %vm270_vm1, %v4286_v6 }
  0xf9   : > { %7136 = vst [vmem:[#allocation14_spill] sm:$0xff] %v6313_v39  ;;  %5056 = vmatprep.mubr.msk.f32.mxu1 %vm270_vm1, %v6308_v11  ;;  %v6326_v50 = vpop.f32.mrf.mxu0 }
  0xfa   : > { %v6328_v14 = vpop.f32.mrf.mxu1 }
  0xfb   : > { %7139 = vst [vmem:[#allocation16_spill] sm:$0xff] %v6328_v14  ;;  %v6330_v40 = vpop.f32.mrf.mxu0  ;;  %5107 = vmatmul.mubr.msk.f32.gmra.mxu0 %vm270_vm1, %v4287_v4 }
  0xfc   : > { %v6332_v39 = vpop.f32.mrf.mxu1  ;;  %5057 = vmatmul.mubr.msk.f32.gmra.mxu1 %vm270_vm1, %v6323_v46  ;;  %5161 = vmatprep.mubr.msk.f32.mxu0 %vm270_vm1, %v7105_v16 }
  0xfd   : > { %7140 = vst [vmem:[#allocation17_spill] sm:$0xff] %v6332_v39  ;;  %5111 = vmatprep.mubr.msk.f32.mxu1 %vm270_vm1, %v5528_v13  ;;  %v6341_v6 = vpop.f32.mrf.mxu0 }
  0xfe   : > { %v6343_v8 = vpop.f32.mrf.mxu1 }
  0xff   : > { %7141 = vst [vmem:[#allocation18_spill] sm:$0xff] %v6343_v8  ;;  %v4863_v14 = vpop.f32.mrf.mxu0  ;;  %5162 = vmatmul.mubr.msk.f32.vlgmr.msra.gmra.mxu0 %vm270_vm1, %v7106_v18 }
 0x100   : > { %v4813_v37 = vpop.f32.mrf.mxu1  ;;  %5112 = vmatmul.mubr.msk.f32.vlgmr.msra.gmra.mxu1 %vm270_vm1, %v5546_v15  ;;  %5164 = vmatprep.mubr.msk.f32.mxu0 %vm270_vm1, %v7107_v20 }
 0x101   : > { %v767_v4 = vadd.f32 %v4813_v37, %v6211_v41  ;;  %5114 = vmatprep.mubr.msk.f32.mxu1 %vm270_vm1, %v5552_v17  ;;  %v1119_v16 = vpop.f32.mrf.mxu0  ;;  %v4332_v37 = vld [vmem:[%s5483_s9 + $0xa9] sm:$0xff] }
 0x102   : > { %v761_v13 = vpop.f32.mrf.mxu1 }
 0x103   : > { %v6354_v39 = vadd.f32 %v4863_v14, %v767_v4  ;;  %v762_v8 = vadd.f32 %v761_v13, %v6223_v47  ;;  %v4866_v11 = vpop.f32.mrf.mxu0  ;;  %5165 = vmatmul.mubr.msk.f32.gmra.mxu0 %vm270_vm1, %v7108_v22 }
 0x104   : > { %v4816_v46 = vpop.f32.mrf.mxu1  ;;  %5115 = vmatmul.mubr.msk.f32.gmra.mxu1 %vm270_vm1, %v5566_v19  ;;  %5167 = vmatprep.mubr.msk.f32.mxu0 %vm270_vm1, %v7109_v24 }
 0x105   : > { %v6361_v15 = vadd.f32 %v1119_v16, %v762_v8  ;;  %v777_v17 = vadd.f32 %v4816_v46, %v6227_v51  ;;  %5117 = vmatprep.mubr.msk.f32.mxu1 %vm270_vm1, %v5572_v21  ;;  %v1129_v20 = vpop.f32.mrf.mxu0  ;;  %v4330_v51 = vld [vmem:[%s5483_s9 + $0x91] sm:$0xff] }
 0x106   : > { %v771_v18 = vpop.f32.mrf.mxu1  ;;  %v4333_v16 = vld [vmem:[%s5483_s9 + $0xb1] sm:$0xff] }
 0x107   : > { %v6368_v41 = vadd.f32 %v4866_v11, %v777_v17  ;;  %v772_v19 = vadd.f32 %v771_v18, %v6239_v59  ;;  %v4869_v14 = vpop.f32.mrf.mxu0  ;;  %5168 = vmatmul.mubr.msk.f32.gmra.mxu0 %vm270_vm1, %v7110_v26  ;;  %v4334_v18 = vld [vmem:[%s5483_s9 + $0xc1] sm:$0xff] }
 0x108   : > { %v4819_v47 = vpop.f32.mrf.mxu1  ;;  %5118 = vmatmul.mubr.msk.f32.gmra.mxu1 %vm270_vm1, %v5586_v23  ;;  %5170 = vmatprep.mubr.msk.f32.mxu0 %vm270_vm1, %v7111_v28 }
 0x109   : > { %v6375_v22 = vadd.f32 %v1129_v20, %v772_v19  ;;  %v787_v21 = vadd.f32 %v4819_v47, %v6243_v61  ;;  %5120 = vmatprep.mubr.msk.f32.mxu1 %vm270_vm1, %v5592_v25  ;;  %v1139_v24 = vpop.f32.mrf.mxu0  ;;  %v4331_v61 = vld [vmem:[%s5483_s9 + $0x99] sm:$0xff] }
 0x10a   : > { %v781_v11 = vpop.f32.mrf.mxu1 }
 0x10b   : > { %v6383_v59 = vadd.f32 %v4869_v14, %v787_v21  ;;  %v782_v23 = vadd.f32 %v781_v11, %v6255_v56  ;;  %v4872_v46 = vpop.f32.mrf.mxu0  ;;  %5171 = vmatmul.mubr.msk.f32.gmra.mxu0 %vm270_vm1, %v7112_v29  ;;  %v4335_v14 = vld [vmem:[%s5483_s9 + $0xc9] sm:$0xff]  ;;  %v4336_v11 = vld [vmem:[%s5483_s9 + $0xd9] sm:$0xff] }
 0x10c   : > { %v4822_v26 = vpop.f32.mrf.mxu1  ;;  %5121 = vmatmul.mubr.msk.f32.gmra.mxu1 %vm270_vm1, %v5606_v27  ;;  %5173 = vmatprep.mubr.msk.f32.mxu0 %vm270_vm1, %v7113_v30 }
 0x10d   : > { %v6390_v25 = vadd.f32 %v1139_v24, %v782_v23  ;;  %v797_v28 = vadd.f32 %v4822_v26, %v6259_v2  ;;  %5123 = vmatprep.mubr.msk.f32.mxu1 %vm270_vm1, %v4330_v51  ;;  %v1149_v8 = vpop.f32.mrf.mxu0  ;;  %v4337_v26 = vld [vmem:[%s5483_s9 + $0xe1] sm:$0xff] }
 0x10e   : > { %v791_v56 = vpop.f32.mrf.mxu1 }
 0x10f   : > { %v6398_v4 = vadd.f32 %v4872_v46, %v797_v28  ;;  %v792_v27 = vadd.f32 %v791_v56, %v6271_v52  ;;  %v4875_v13 = vpop.f32.mrf.mxu0  ;;  %5174 = vmatmul.mubr.msk.f32.gmra.mxu0 %vm270_vm1, %v7114_v31  ;;  %v4338_v28 = vld [vmem:[%s5483_s9 + $0xf1] sm:$0xff] }
 0x110   : > { %v4825_v29 = vpop.f32.mrf.mxu1  ;;  %5124 = vmatmul.mubr.msk.f32.gmra.mxu1 %vm270_vm1, %v4331_v61  ;;  %5176 = vmatprep.mubr.msk.f32.mxu0 %vm270_vm1, %v7115_v32 }
 0x111   : > { %v6404_v2 = vadd.f32 %v1149_v8, %v792_v27  ;;  %v807_v30 = vadd.f32 %v4825_v29, %v6275_v10  ;;  %5126 = vmatprep.mubr.msk.f32.mxu1 %vm270_vm1, %v4332_v37  ;;  %v1159_v52 = vpop.f32.mrf.mxu0  ;;  %v4339_v37 = vld [vmem:[%s5483_s9 + $0xf9] sm:$0xff]  ;;  %v4340_v29 = vld [vmem:[%s5483_s9 + $0x109] sm:$0xff] }
 0x112   : > { %v801_v17 = vpop.f32.mrf.mxu1 }
 0x113   : > { %v6412_v20 = vadd.f32 %v4875_v13, %v807_v30  ;;  %v802_v19 = vadd.f32 %v801_v17, %v6287_v48  ;;  %v4878_v47 = vpop.f32.mrf.mxu0  ;;  %5177 = vmatmul.mubr.msk.f32.gmra.mxu0 %vm270_vm1, %v7116_v33  ;;  %v4341_v17 = vld [vmem:[%s5483_s9 + $0x111] sm:$0xff] }
 0x114   : > { %v4828_v31 = vpop.f32.mrf.mxu1  ;;  %5127 = vmatmul.mubr.msk.f32.gmra.mxu1 %vm270_vm1, %v4333_v16  ;;  %5179 = vmatprep.mubr.msk.f32.mxu0 %vm270_vm1, %v7117_v34 }
 0x115   : > { %v6418_v10 = vadd.f32 %v1159_v52, %v802_v19  ;;  %v817_v32 = vadd.f32 %v4828_v31, %v6291_v7  ;;  %5129 = vmatprep.mubr.msk.f32.mxu1 %vm270_vm1, %v4334_v18  ;;  %v1169_v48 = vpop.f32.mrf.mxu0  ;;  %v4342_v18 = vld [vmem:[%s5483_s9 + $0x121] sm:$0xff] }
 0x116   : > { %v811_v21 = vpop.f32.mrf.mxu1 }
 0x117   : > { %v6426_v24 = vadd.f32 %v4878_v47, %v817_v32  ;;  %v812_v51 = vadd.f32 %v811_v21, %v6303_v42  ;;  %v4881_v23 = vpop.f32.mrf.mxu0  ;;  %5180 = vmatmul.mubr.msk.f32.gmra.mxu0 %vm270_vm1, %v7118_v35  ;;  %v4343_v32 = vld [vmem:[%s5483_s9 + $0x129] sm:$0xff]  ;;  %v4344_v21 = vld [vmem:[%s5483_s9 + $0x139] sm:$0xff] }
 0x118   : > { %v4831_v33 = vpop.f32.mrf.mxu1  ;;  %5130 = vmatmul.mubr.msk.f32.gmra.mxu1 %vm270_vm1, %v4335_v14  ;;  %5182 = vmatprep.mubr.msk.f32.mxu0 %vm270_vm1, %v7119_v36 }
 0x119   : > { %v6432_v7 = vadd.f32 %v1169_v48, %v812_v51  ;;  %v827_v34 = vadd.f32 %v4831_v33, %v6311_v12  ;;  %5132 = vmatprep.mubr.msk.f32.mxu1 %vm270_vm1, %v4336_v11  ;;  %v1179_v42 = vpop.f32.mrf.mxu0  ;;  %v4345_v33 = vld [vmem:[%s5483_s9 + $0x141] sm:$0xff] }
 0x11a   : > { %v821_v46 = vpop.f32.mrf.mxu1 }
 0x11b   : > { %v6440_v61 = vadd.f32 %v4881_v23, %v827_v34  ;;  %v822_v56 = vadd.f32 %v821_v46, %v6326_v50  ;;  %v4884_v8 = vpop.f32.mrf.mxu0  ;;  %5183 = vmatmul.mubr.msk.f32.gmra.mxu0 %vm270_vm1, %v7120_v44  ;;  %v4346_v34 = vld [vmem:[%s5483_s9 + $0x151] sm:$0xff] }
 0x11c   : > { %v4834_v35 = vpop.f32.mrf.mxu1  ;;  %5133 = vmatmul.mubr.msk.f32.gmra.mxu1 %vm270_vm1, %v4337_v26  ;;  %5185 = vmatprep.mubr.msk.f32.mxu0 %vm270_vm1, %v7121_v45 }
 0x11d   : > { %v6446_v12 = vadd.f32 %v1179_v42, %v822_v56  ;;  %v837_v36 = vadd.f32 %v4834_v35, %v6330_v40  ;;  %5135 = vmatprep.mubr.msk.f32.mxu1 %vm270_vm1, %v4338_v28  ;;  %v1189_v50 = vpop.f32.mrf.mxu0  ;;  %v4347_v28 = vld [vmem:[%s5483_s9 + $0x159] sm:$0xff]  ;;  %v4348_v35 = vld [vmem:[%s5483_s9 + $0x169] sm:$0xff] }
 0x11e   : > { %v831_v27 = vpop.f32.mrf.mxu1 }
 0x11f   : > { %v6454_v13 = vadd.f32 %v4884_v8, %v837_v36  ;;  %v832_v30 = vadd.f32 %v831_v27, %v6341_v6  ;;  %v4887_v16 = vpop.f32.mrf.mxu0  ;;  %5186 = vmatmul.mubr.msk.f32.gmra.mxu0 %vm270_vm1, %v7122_v55  ;;  %v4414_v8 = vld [vmem:[%s5483_s9 + $0x16a] sm:$0xff] }
 0x120   : > { %v4837_v44 = vpop.f32.mrf.mxu1  ;;  %5136 = vmatmul.mubr.msk.f32.gmra.mxu1 %vm270_vm1, %v4339_v37  ;;  %5188 = vmatprep.mubr.msk.f32.mxu0 %vm270_vm1, %v7123_v57 }
 0x121   : > { %v6460_v40 = vadd.f32 %v1189_v50, %v832_v30  ;;  %v847_v45 = vadd.f32 %v4837_v44, %v6213_v43  ;;  %5138 = vmatprep.mubr.msk.f32.mxu1 %vm270_vm1, %v4340_v29  ;;  %v1199_v6 = vpop.f32.mrf.mxu0  ;;  %v4349_v30 = vld [vmem:[%s5483_s9 + $0x171] sm:$0xff] }
 0x122   : > { %v841_v52 = vpop.f32.mrf.mxu1  ;;  %v4415_v44 = vld [vmem:[%s5483_s9 + $0x172] sm:$0xff] }
 0x123   : > { %v6468_v19 = vadd.f32 %v4887_v16, %v847_v45  ;;  %v842_v31 = vadd.f32 %v841_v52, %v6225_v49  ;;  %v4890_v47 = vpop.f32.mrf.mxu0  ;;  %5189 = vmatmul.mubr.msk.f32.gmra.mxu0 %vm270_vm1, %v7124_v0 }
 0x124   : > { %v4840_v55 = vpop.f32.mrf.mxu1  ;;  %5139 = vmatmul.mubr.msk.f32.gmra.mxu1 %vm270_vm1, %v4341_v17  ;;  %5191 = vmatprep.mubr.msk.f32.mxu0 %vm270_vm1, %v7125_v62  ;;  %v7144_v17 = vld [vmem:[#allocation10_spill] sm:$0xff] }
 0x125   : > { %v6474_v43 = vadd.f32 %v1199_v6, %v842_v31  ;;  %v857_v57 = vadd.f32 %v4840_v55, %v6229_v53  ;;  %5141 = vmatprep.mubr.msk.f32.mxu1 %vm270_vm1, %v4342_v18  ;;  %v1209_v49 = vpop.f32.mrf.mxu0  ;;  %v7145_v55 = vld [vmem:[#allocation11_spill] sm:$0xff] }
 0x126   : > { %v851_v14 = vpop.f32.mrf.mxu1 }
 0x127   : > { %v6482_v48 = vadd.f32 %v4890_v47, %v857_v57  ;;  %v852_v11 = vadd.f32 %v851_v14, %v6241_v60  ;;  %v4893_v51 = vpop.f32.mrf.mxu0  ;;  %5192 = vmatmul.mubr.msk.f32.gmra.mxu0 %vm270_vm1, %v7126_v5  ;;  %v7146_v57 = vld [vmem:[#allocation39_spill] sm:$0xff] }
 0x128   : > { %v4843_v0 = vpop.f32.mrf.mxu1  ;;  %5142 = vmatmul.mubr.msk.f32.gmra.mxu1 %vm270_vm1, %v4343_v32  ;;  %5194 = vmatprep.mubr.msk.f32.mxu0 %vm270_vm1, %v7127_v58  ;;  %v7147_v32 = vld [vmem:[#allocation13_spill] sm:$0xff] }
 0x129   : > { %v6488_v53 = vadd.f32 %v1209_v49, %v852_v11  ;;  %v867_v62 = vadd.f32 %v4843_v0, %v6245_v63  ;;  %5144 = vmatprep.mubr.msk.f32.mxu1 %vm270_vm1, %v4344_v21  ;;  %v1219_v60 = vpop.f32.mrf.mxu0  ;;  %v4352_v21 = vld [vmem:[%s5483_s9 + $0x199] sm:$0xff] }
 0x12a   : > { %v861_v23 = vpop.f32.mrf.mxu1  ;;  %v4418_v11 = vld [vmem:[%s5483_s9 + $0x19a] sm:$0xff] }
 0x12b   : > { %v6496_v26 = vadd.f32 %v4893_v51, %v867_v62  ;;  %v862_v5 = vadd.f32 %v861_v23, %v6257_v1  ;;  %v4896_v42 = vpop.f32.mrf.mxu0  ;;  %5195 = vmatmul.mubr.msk.f32.gmra.mxu0 %vm270_vm1, %v7129_v38  ;;  %v7148_v51 = vld [vmem:[#allocation12_spill] sm:$0xff] }
 0x12c   : > { %v4846_v46 = vpop.f32.mrf.mxu1  ;;  %5145 = vmatmul.mubr.msk.f32.gmra.mxu1 %vm270_vm1, %v4345_v33  ;;  %5197 = vmatprep.mubr.msk.f32.mxu0 %vm270_vm1, %v7130_v54  ;;  %v7143_v54 = vld [vmem:[#allocation9_spill] sm:$0xff] }
 0x12d   : > { %v6502_v63 = vadd.f32 %v1219_v60, %v862_v5  ;;  %v877_v58 = vadd.f32 %v4846_v46, %v6261_v3  ;;  %5147 = vmatprep.mubr.msk.f32.mxu1 %vm270_vm1, %v4346_v34  ;;  %v1229_v56 = vpop.f32.mrf.mxu0  ;;  %v7142_v3 = vld [vmem:[#allocation36_spill] sm:$0xff]  ;;  %v7150_v34 = vld [vmem:[#allocation15_spill] sm:$0xff]  ;;  %v7151_v46 = vld [vmem:[#allocation14_spill] sm:$0xff] }
 0x12e   : > { %v871_v1 = vpop.f32.mrf.mxu1  ;;  %v7149_v60 = vld [vmem:[#allocation8_spill] sm:$0xff] }
 0x12f   : > { %v6511_v36 = vadd.f32 %v4896_v42, %v877_v58  ;;  %v872_v38 = vadd.f32 %v871_v1, %v6273_v9  ;;  %v4899_v27 = vpop.f32.mrf.mxu0  ;;  %5198 = vmatmul.mubr.msk.f32.gmra.mxu0 %vm270_vm1, %v7142_v3  ;;  %v4353_v58 = vld [vmem:[%s5483_s9 + $0x1a1] sm:$0xff] }
 0x130   : > { %v4849_v37 = vpop.f32.mrf.mxu1  ;;  %5148 = vmatmul.mubr.msk.f32.gmra.mxu1 %vm270_vm1, %v4347_v28  ;;  %5200 = vmatprep.mubr.msk.f32.mxu0 %vm270_vm1, %v4414_v8  ;;  %v4419_v28 = vld [vmem:[%s5483_s9 + $0x1a2] sm:$0xff]  ;;  %s6813_s9 = scalar_lea.vmem [#allocation2], %s3954_s8 }
 0x131   : > { %v6517_v50 = vadd.f32 %v1229_v56, %v872_v38  ;;  %v887_v29 = vadd.f32 %v4849_v37, %v7143_v54  ;;  %5150 = vmatprep.mubr.msk.f32.mxu1 %vm270_vm1, %v4348_v35  ;;  %v1239_v16 = vpop.f32.mrf.mxu0  ;;  %v7152_v8 = vld [vmem:[#allocation16_spill] sm:$0xff]  ;;  %v7153_v54 = vld [vmem:[#allocation17_spill] sm:$0xff]  ;;  %s3821_s11 = sshll.u32 %s6813_s9, 4  ;;  %s6932_s11 = int_to_ptr.vmem [resolvable:$true] %s3821_s11 }
 0x132   : > { %v881_v9 = vpop.f32.mrf.mxu1  ;;  %s5275_s26 = scalar_lea.vmem %s6932_s11, 4096  ;;  %p5282_p1 = scmp.lt.s32.totalorder %s6932_s11, %s5280_s28 }
 0x133   : > { %v6524_v45 = vadd.f32 %v4899_v27, %v887_v29  ;;  %v882_v52 = vadd.f32 %v881_v9, %v7144_v17  ;;  %v4902_v18 = vpop.f32.mrf.mxu0  ;;  %5201 = vmatmul.mubr.msk.f32.gmra.mxu0 %vm270_vm1, %v4415_v44  ;;  %p5276_p12 = scmp.ne.s32.totalorder %s6932_s11, %s5275_s26  ;;  %p5283_p2 = scmp.lt.s32.totalorder %s5281_s29, %s5275_s26 }
 0x134   : > { %v4852_v6 = vpop.f32.mrf.mxu1  ;;  %5151 = vmatmul.mubr.msk.f32.gmra.mxu1 %vm270_vm1, %v4349_v30  ;;  %5203 = vmatprep.mubr.msk.f32.mxu0 %vm270_vm1, %v7147_v32 }
 0x135   : > { %v6529_v31 = vadd.f32 %v1239_v16, %v882_v52  ;;  %v897_v47 = vadd.f32 %v4852_v6, %v7145_v55  ;;  %5153 = vmatprep.mubr.msk.f32.mxu1 %vm270_vm1, %v7146_v57  ;;  %v1249_v49 = vpop.f32.mrf.mxu0  ;;  %v7154_v16 = vld [vmem:[#allocation18_spill] sm:$0xff]  ;;  %p5277_p13 = pnand %p5276_p12, %p5448_p4  ;;  %p5284_p3 = por %p5283_p2, %p5282_p1 }
 0x136   : > { %v891_v14 = vpop.f32.mrf.mxu1 }
 0x137   : > { %v6538_v0 = vadd.f32 %v4902_v18, %v897_v47  ;;  %v892_v62 = vadd.f32 %v891_v14, %v7148_v51  ;;  %v4905_v23 = vpop.f32.mrf.mxu0  ;;  %5204 = vmatmul.mubr.msk.f32.gmra.mxu0 %vm270_vm1, %v7150_v34  ;;  %p5278_p0 = pneg %p5277_p13 }
 0x138   : > { %v4855_v33 = vpop.f32.mrf.mxu1  ;;  %5154 = vmatmul.mubr.msk.f32.gmra.mxu1 %vm270_vm1, %v7149_v60  ;;  %5206 = vmatprep.mubr.msk.f32.mxu0 %vm270_vm1, %v4418_v11 }
 0x139   : > { %v6545_v5 = vadd.f32 %v1249_v49, %v892_v62  ;;  %v907_v42 = vadd.f32 %v4855_v33, %v7151_v46  ;;  %5156 = vmatprep.mubr.msk.f32.mxu1 %vm270_vm1, %v4352_v21  ;;  %v1259_v56 = vpop.f32.mrf.mxu0  ;;  %p5285_p5 = pnand %p5284_p3, %p5278_p0 }
 0x13a   : > { %v901_v1 = vpop.f32.mrf.mxu1 }
 0x13b   : > { %v6552_v35 = vadd.f32 %v4905_v23, %v907_v42  ;;  %v902_v38 = vadd.f32 %v901_v1, %v7152_v8  ;;  %v4908_v27 = vpop.f32.mrf.mxu0  ;;  %5207 = vmatmul.mubr.msk.f32.gmra.mxu0 %vm270_vm1, %v4419_v28 }
 0x13c   : > { %v4858_v37 = vpop.f32.mrf.mxu1  ;;  %5157 = vmatmul.mubr.msk.f32.gmra.mxu1 %vm270_vm1, %v4353_v58 }
 0x13d   : > { %v6557_v3 = vadd.f32 %v1259_v56, %v902_v38  ;;  %v917_v29 = vadd.f32 %v4858_v37, %v7153_v54  ;;  %v1269_v44 = vpop.f32.mrf.mxu0 }
 0x13e   : > { %v911_v30 = vpop.f32.mrf.mxu1 }
 0x13f   : > { %v6560_v9 = vadd.f32 %v4908_v27, %v917_v29  ;;  %v912_v17 = vadd.f32 %v911_v30, %v7154_v16  ;;  %v4963_v6 = vpop.f32.mrf.mxu0 }
 0x140   : > { %v4913_v52 = vpop.f32.mrf.mxu1 }
 0x141   : > { %v6563_v18 = vadd.f32 %v1269_v44, %v912_v17  ;;  %v1672_v55 = vadd.f32 %v4913_v52, %v6354_v39  ;;  %v1902_v57 = vpop.f32.mrf.mxu0 }
 0x142   : > { %v1512_v47 = vpop.f32.mrf.mxu1 }
 0x143   : > { %v6566_v32 = vadd.f32 %v4963_v6, %v1672_v55  ;;  %v1671_v14 = vadd.f32 %v1512_v47, %v6361_v15  ;;  %v4966_v21 = vpop.f32.mrf.mxu0 }
 0x144   : > { %v4916_v49 = vpop.f32.mrf.mxu1 }
 0x145   : > { %v6569_v11 = vadd.f32 %v1902_v57, %v1671_v14  ;;  %v1674_v51 = vadd.f32 %v4916_v49, %v6368_v41  ;;  %v1912_v33 = vpop.f32.mrf.mxu0 }
 0x146   : > { %v1522_v62 = vpop.f32.mrf.mxu1 }
 0x147   : > { %v6572_v23 = vadd.f32 %v4966_v21, %v1674_v51  ;;  %v1673_v60 = vadd.f32 %v1522_v62, %v6375_v22  ;;  %v4969_v39 = vpop.f32.mrf.mxu0 }
 0x148   : > { %v4919_v34 = vpop.f32.mrf.mxu1 }
 0x149   : > { %v6575_v46 = vadd.f32 %v1912_v33, %v1673_v60  ;;  %v1676_v42 = vadd.f32 %v4919_v34, %v6383_v59  ;;  %v1922_v15 = vpop.f32.mrf.mxu0 }
 0x14a   : > { %v1532_v58 = vpop.f32.mrf.mxu1 }
 0x14b   : > { %v6578_v28 = vadd.f32 %v4969_v39, %v1676_v42  ;;  %v1675_v1 = vadd.f32 %v1532_v58, %v6390_v25  ;;  %v4972_v41 = vpop.f32.mrf.mxu0 }
 0x14c   : > { %v4922_v56 = vpop.f32.mrf.mxu1 }
 0x14d   : > { %v6581_v8 = vadd.f32 %v1922_v15, %v1675_v1  ;;  %v1678_v38 = vadd.f32 %v4922_v56, %v6398_v4  ;;  %v1932_v22 = vpop.f32.mrf.mxu0 }
 0x14e   : > { %v1542_v37 = vpop.f32.mrf.mxu1 }
 0x14f   : > { %v6584_v27 = vadd.f32 %v4972_v41, %v1678_v38  ;;  %v1677_v54 = vadd.f32 %v1542_v37, %v6404_v2  ;;  %v4975_v59 = vpop.f32.mrf.mxu0 }
 0x150   : > { %v4925_v29 = vpop.f32.mrf.mxu1 }
 0x151   : > { %v6587_v30 = vadd.f32 %v1932_v22, %v1677_v54  ;;  %v1680_v44 = vadd.f32 %v4925_v29, %v6412_v20  ;;  %v1942_v25 = vpop.f32.mrf.mxu0 }
 0x152   : > { %v1552_v16 = vpop.f32.mrf.mxu1 }
 0x153   : > { %v6590_v17 = vadd.f32 %v4975_v59, %v1680_v44  ;;  %v1679_v52 = vadd.f32 %v1552_v16, %v6418_v10  ;;  %v4978_v4 = vpop.f32.mrf.mxu0 }
 0x154   : > { %v4928_v6 = vpop.f32.mrf.mxu1 }
 0x155   : > { %v6593_v55 = vadd.f32 %v1942_v25, %v1679_v52  ;;  %v1682_v47 = vadd.f32 %v4928_v6, %v6426_v24  ;;  %v1952_v2 = vpop.f32.mrf.mxu0 }
 0x156   : > { %v1562_v57 = vpop.f32.mrf.mxu1 }
 0x157   : > { %v6596_v14 = vadd.f32 %v4978_v4, %v1682_v47  ;;  %v1681_v49 = vadd.f32 %v1562_v57, %v6432_v7  ;;  %v4981_v20 = vpop.f32.mrf.mxu0 }
 0x158   : > { %v4931_v21 = vpop.f32.mrf.mxu1 }
 0x159   : > { %v6599_v51 = vadd.f32 %v1952_v2, %v1681_v49  ;;  %v1684_v62 = vadd.f32 %v4931_v21, %v6440_v61  ;;  %v1962_v10 = vpop.f32.mrf.mxu0 }
 0x15a   : > { %v1572_v33 = vpop.f32.mrf.mxu1 }
 0x15b   : > { %v6602_v60 = vadd.f32 %v4981_v20, %v1684_v62  ;;  %v1683_v34 = vadd.f32 %v1572_v33, %v6446_v12  ;;  %v4984_v24 = vpop.f32.mrf.mxu0 }
 0x15c   : > { %v4934_v39 = vpop.f32.mrf.mxu1 }
 0x15d   : > { %v6605_v42 = vadd.f32 %v1962_v10, %v1683_v34  ;;  %v1686_v58 = vadd.f32 %v4934_v39, %v6454_v13  ;;  %v1972_v7 = vpop.f32.mrf.mxu0 }
 0x15e   : > { %v1582_v15 = vpop.f32.mrf.mxu1 }
 0x15f   : > { %v6608_v1 = vadd.f32 %v4984_v24, %v1686_v58  ;;  %v1685_v56 = vadd.f32 %v1582_v15, %v6460_v40  ;;  %v4987_v61 = vpop.f32.mrf.mxu0 }
 0x160   : > { %v4937_v41 = vpop.f32.mrf.mxu1 }
 0x161   : > { %v6611_v38 = vadd.f32 %v1972_v7, %v1685_v56  ;;  %v1688_v37 = vadd.f32 %v4937_v41, %v6468_v19  ;;  %v1982_v12 = vpop.f32.mrf.mxu0 }
 0x162   : > { %v1592_v22 = vpop.f32.mrf.mxu1 }
 0x163   : > { %v6614_v54 = vadd.f32 %v4987_v61, %v1688_v37  ;;  %v1687_v29 = vadd.f32 %v1592_v22, %v6474_v43  ;;  %v4990_v13 = vpop.f32.mrf.mxu0 }
 0x164   : > { %v4940_v59 = vpop.f32.mrf.mxu1 }
 0x165   : > { %v6617_v44 = vadd.f32 %v1982_v12, %v1687_v29  ;;  %v1690_v16 = vadd.f32 %v4940_v59, %v6482_v48  ;;  %v1992_v40 = vpop.f32.mrf.mxu0 }
 0x166   : > { %v1602_v25 = vpop.f32.mrf.mxu1 }
 0x167   : > { %v6620_v52 = vadd.f32 %v4990_v13, %v1690_v16  ;;  %v1689_v6 = vadd.f32 %v1602_v25, %v6488_v53  ;;  %v4993_v19 = vpop.f32.mrf.mxu0 }
 0x168   : > { %v4943_v4 = vpop.f32.mrf.mxu1 }
 0x169   : > { %7155 = vst [vmem:[#allocation19_spill] sm:$0xff] %v6620_v52  ;;  %v6623_v47 = vadd.f32 %v1992_v40, %v1689_v6  ;;  %v1692_v57 = vadd.f32 %v4943_v4, %v6496_v26  ;;  %v2002_v43 = vpop.f32.mrf.mxu0 }
 0x16a   : > { %v1612_v2 = vpop.f32.mrf.mxu1 }
 0x16b   : > { %7156 = vst [vmem:[#allocation20_spill] sm:$0xff] %v6623_v47  ;;  %v6626_v49 = vadd.f32 %v4993_v19, %v1692_v57  ;;  %v1691_v21 = vadd.f32 %v1612_v2, %v6502_v63  ;;  %v4996_v48 = vpop.f32.mrf.mxu0 }
 0x16c   : > { %v4946_v20 = vpop.f32.mrf.mxu1 }
 0x16d   : > { %7157 = vst [vmem:[#allocation21_spill] sm:$0xff] %v6626_v49  ;;  %v6629_v62 = vadd.f32 %v2002_v43, %v1691_v21  ;;  %v1694_v33 = vadd.f32 %v4946_v20, %v6511_v36  ;;  %v2012_v53 = vpop.f32.mrf.mxu0 }
 0x16e   : > { %v1622_v10 = vpop.f32.mrf.mxu1 }
 0x16f   : > { %7158 = vst [vmem:[#allocation22_spill] sm:$0xff] %v6629_v62  ;;  %v6632_v34 = vadd.f32 %v4996_v48, %v1694_v33  ;;  %v1693_v39 = vadd.f32 %v1622_v10, %v6517_v50  ;;  %v4999_v26 = vpop.f32.mrf.mxu0 }
 0x170   : > { %v4949_v24 = vpop.f32.mrf.mxu1 }
 0x171   : > { %7159 = vst [vmem:[#allocation23_spill] sm:$0xff] %v6632_v34  ;;  %v6635_v58 = vadd.f32 %v2012_v53, %v1693_v39  ;;  %v1696_v15 = vadd.f32 %v4949_v24, %v6524_v45  ;;  %v2022_v63 = vpop.f32.mrf.mxu0 }
 0x172   : > { %v1632_v7 = vpop.f32.mrf.mxu1 }
 0x173   : > { %7160 = vst [vmem:[#allocation24_spill] sm:$0xff] %v6635_v58  ;;  %v6638_v56 = vadd.f32 %v4999_v26, %v1696_v15  ;;  %v1695_v41 = vadd.f32 %v1632_v7, %v6529_v31  ;;  %v5002_v36 = vpop.f32.mrf.mxu0 }
 0x174   : > { %v4952_v61 = vpop.f32.mrf.mxu1 }
 0x175   : > { %7161 = vst [vmem:[#allocation25_spill] sm:$0xff] %v6638_v56  ;;  %v6641_v37 = vadd.f32 %v2022_v63, %v1695_v41  ;;  %v1698_v22 = vadd.f32 %v4952_v61, %v6538_v0  ;;  %v2032_v50 = vpop.f32.mrf.mxu0  ;;  %v5383_v61 = vmov 0.0  }
 0x176   : > { %v1642_v12 = vpop.f32.mrf.mxu1  ;;  %199 = vst [vmem:[%s6693_s7] sm:$0x3] %v5383_v61 }
 0x177   : > { %7162 = vst [vmem:[#allocation26_spill] sm:$0xff] %v6641_v37  ;;  %v6644_v29 = vadd.f32 %v5002_v36, %v1698_v22  ;;  %v1697_v59 = vadd.f32 %v1642_v12, %v6545_v5  ;;  %v5005_v45 = vpop.f32.mrf.mxu0 }
 0x178   : > { %v4955_v13 = vpop.f32.mrf.mxu1 }
 0x179   : > { %7163 = vst [vmem:[#allocation27_spill] sm:$0xff] %v6644_v29  ;;  %v6647_v16 = vadd.f32 %v2032_v50, %v1697_v59  ;;  %v1700_v25 = vadd.f32 %v4955_v13, %v6552_v35  ;;  %v2042_v31 = vpop.f32.mrf.mxu0 }
 0x17a   : > { %v1652_v40 = vpop.f32.mrf.mxu1 }
 0x17b   : > { %7164 = vst [vmem:[#allocation28_spill] sm:$0xff] %v6647_v16  ;;  %v6650_v6 = vadd.f32 %v5005_v45, %v1700_v25  ;;  %v1699_v4 = vadd.f32 %v1652_v40, %v6557_v3  ;;  %v5008_v0 = vpop.f32.mrf.mxu0 }
 0x17c   : > { %v4958_v19 = vpop.f32.mrf.mxu1 }
 0x17d   : > { %7165 = vst [vmem:[#allocation29_spill] sm:$0xff] %v6650_v6  ;;  %v6653_v57 = vadd.f32 %v2042_v31, %v1699_v4  ;;  %v1702_v2 = vadd.f32 %v4958_v19, %v6560_v9  ;;  %v2052_v43 = vpop.f32.mrf.mxu0 }
 0x17e   : > { %v1662_v5 = vpop.f32.mrf.mxu1 }
 0x17f   : > { %7166 = vst [vmem:[#allocation30_spill] sm:$0xff] %v6653_v57  ;;  %v6656_v21 = vadd.f32 %v5008_v0, %v1702_v2  ;;  %v1701_v20 = vadd.f32 %v1662_v5, %v6563_v18  ;;  %v6661_v48 = vpop.f32.mrf.mxu0 }
 0x180   : > { %v6659_v35 = vpop.f32.mrf.mxu1 }
 0x181   : > { %7167 = vst [vmem:[#allocation31_spill] sm:$0xff] %v6656_v21  ;;  %v6663_v33 = vadd.f32 %v2052_v43, %v1701_v20  ;;  %v6667_v10 = vpop.f32.mrf.mxu0 }
 0x182   : > { %v6665_v3 = vpop.f32.mrf.mxu1 }
 0x183   : > { %7168 = vst [vmem:[#allocation32_spill] sm:$0xff] %v6663_v33  ;;  %v6671_v9 = vpop.f32.mrf.mxu0 }
 0x184   : > { %v6669_v53 = vpop.f32.mrf.mxu1 }
 0x185   : > { %v6675_v24 = vpop.f32.mrf.mxu0 }
 0x186   : > { %v6673_v39 = vpop.f32.mrf.mxu1 }
 0x187   : > { %v6679_v18 = vpop.f32.mrf.mxu0 }
 0x188   : > { %v6677_v26 = vpop.f32.mrf.mxu1 }
 0x189   : > { %v6686_v7 = vpop.f32.mrf.mxu0 }
 0x18a   : > { %v6684_v15 = vpop.f32.mrf.mxu1 }
 0x18b   : > { %v6691_v41 = vpop.f32.mrf.mxu0 }
 0x18c   : > { %v6689_v63 = vpop.f32.mrf.mxu1 }
 0x18d   : > { %v6698_v22 = vpop.f32.mrf.mxu0 }
 0x18e   : > { %v6696_v36 = vpop.f32.mrf.mxu1 }
 0x18f   : > { %v6702_v50 = vpop.f32.mrf.mxu0 }
 0x190   : > { %v6700_v12 = vpop.f32.mrf.mxu1 }
 0x191   : > { %v6706_v13 = vpop.f32.mrf.mxu0 }
 0x192   : > { %v6704_v59 = vpop.f32.mrf.mxu1 }
 0x193   : > { %v6710_v25 = vpop.f32.mrf.mxu0 }
 0x194   : > { %v6708_v45 = vpop.f32.mrf.mxu1 }
 0x195   : > { %v6714_v31 = vpop.f32.mrf.mxu0 }
 0x196   : > { %v6712_v40 = vpop.f32.mrf.mxu1 }
 0x197   : > { %v6718_v19 = vpop.f32.mrf.mxu0 }
 0x198   : > { %v6716_v4 = vpop.f32.mrf.mxu1 }
 0x199   : > { %v6722_v2 = vpop.f32.mrf.mxu0 }
 0x19a   : > { %v6720_v0 = vpop.f32.mrf.mxu1 }
 0x19b   : > { %v6726_v43 = vpop.f32.mrf.mxu0 }
 0x19c   : > { %v6724_v5 = vpop.f32.mrf.mxu1 }
 0x19d   : > { %v6730_v61 = vpop.f32.mrf.mxu0 }
 0x19e   : > { %v6728_v20 = vpop.f32.mrf.mxu1 }
 0x19f   : > { %v6734_v21 = vpop.f32.mrf.mxu0 }
 0x1a0   : > { %v6732_v33 = vpop.f32.mrf.mxu1 }
 0x1a1   : > { %v6738_v6 = vpop.f32.mrf.mxu0 }
 0x1a2   : > { %v6736_v57 = vpop.f32.mrf.mxu1  ;;  %7169 = vst [vmem:[#allocation33_spill] sm:$0xff] %v6738_v6 }
 0x1a3   : > { %v6742_v29 = vpop.f32.mrf.mxu0 }
 0x1a4   : > { %v6740_v16 = vpop.f32.mrf.mxu1  ;;  %7171 = vst [vmem:[#allocation35_spill] sm:$0xff] %v6742_v29 }
 0x1a5   : > { %7170 = vst [vmem:[#allocation34_spill] sm:$0xff] %v6740_v16  ;;  %v6746_v56 = vpop.f32.mrf.mxu0 }
 0x1a6   : > { %v6744_v37 = vpop.f32.mrf.mxu1  ;;  %7173 = vst [vmem:[#allocation38_spill] sm:$0xff] %v6746_v56 }
 0x1a7   : > { %7172 = vst [vmem:[#allocation37_spill] sm:$0xff] %v6744_v37  ;;  %v6750_v34 = vpop.f32.mrf.mxu0 }
 0x1a8   : > { %v6748_v58 = vpop.f32.mrf.mxu1  ;;  %7175 = vst [vmem:[#allocation9_spill] sm:$0xff] %v6750_v34 }
 0x1a9   : > { %7174 = vst [vmem:[#allocation36_spill] sm:$0xff] %v6748_v58  ;;  %v6754_v49 = vpop.f32.mrf.mxu0 }
 0x1aa   : > { %v6752_v62 = vpop.f32.mrf.mxu1  ;;  %7176 = vst [vmem:[#allocation10_spill] sm:$0xff] %v6754_v49 }
 0x1ab   : > { %v6758_v52 = vpop.f32.mrf.mxu0 }
 0x1ac   : > { %v6756_v47 = vpop.f32.mrf.mxu1  ;;  %7178 = vst [vmem:[#allocation39_spill] sm:$0xff] %v6758_v52 }
 0x1ad   : > { %7177 = vst [vmem:[#allocation11_spill] sm:$0xff] %v6756_v47  ;;  %v6762_v16 = vpop.f32.mrf.mxu0 }
 0x1ae   : > { %v6760_v6 = vpop.f32.mrf.mxu1  ;;  %7180 = vst [vmem:[#allocation12_spill] sm:$0xff] %v6762_v16 }
 0x1af   : > { %7179 = vst [vmem:[#allocation13_spill] sm:$0xff] %v6760_v6  ;;  %v6766_v37 = vpop.f32.mrf.mxu0 }
 0x1b0   : > { %v6764_v29 = vpop.f32.mrf.mxu1  ;;  %7182 = vst [vmem:[#allocation15_spill] sm:$0xff] %v6766_v37 }
 0x1b1   : > { %7181 = vst [vmem:[#allocation8_spill] sm:$0xff] %v6764_v29  ;;  %v6770_v58 = vpop.f32.mrf.mxu0 }
 0x1b2   : > { %v6768_v56 = vpop.f32.mrf.mxu1  ;;  %7184 = vst [vmem:[#allocation16_spill] sm:$0xff] %v6770_v58  ;;  %v2452_v58 = vadd.f32 %v6659_v35, %v6566_v32  ;;  %v2453_v35 = vadd.f32 %v6673_v39, %v6575_v46 }
 0x1b3   : > { %7183 = vst [vmem:[#allocation14_spill] sm:$0xff] %v6768_v56  ;;  %v6774_v49 = vpop.f32.mrf.mxu0 }
 0x1b4   : > { %v6772_v34 = vpop.f32.mrf.mxu1  ;;  %7186 = vst [vmem:[#allocation18_spill] sm:$0xff] %v6774_v49  ;;  %v2451_v49 = vadd.f32 %v6665_v3, %v6569_v11  ;;  %v2456_v11 = vadd.f32 %v6677_v26, %v6578_v28 }
 0x1b5   : > { %7185 = vst [vmem:[#allocation17_spill] sm:$0xff] %v6772_v34  ;;  %v6778_v52 = vpop.f32.mrf.mxu0 }
 0x1b6   : > { %v6776_v47 = vpop.f32.mrf.mxu1  ;;  %7188 = vst [vmem:[#allocation41_spill] sm:$0xff] %v6778_v52  ;;  %v2844_v32 = vadd.f32 %v6667_v10, %v2451_v49  ;;  %v2455_v49 = vadd.f32 %v6684_v15, %v6581_v8  ;;  %v2458_v8 = vadd.f32 %v6689_v63, %v6584_v27 }
 0x1b7   : > { %7187 = vst [vmem:[#allocation40_spill] sm:$0xff] %v6776_v47  ;;  %v6782_v16 = vpop.f32.mrf.mxu0 }
 0x1b8   : > { %v6780_v6 = vpop.f32.mrf.mxu1  ;;  %7190 = vst [vmem:[#allocation43_spill] sm:$0xff] %v6782_v16  ;;  %v2845_v16 = vadd.f32 %v6661_v48, %v2452_v58 }
 0x1b9   : > { %7189 = vst [vmem:[#allocation42_spill] sm:$0xff] %v6780_v6  ;;  %v6786_v37 = vpop.f32.mrf.mxu0 }
 0x1ba   : > { %v6784_v29 = vpop.f32.mrf.mxu1  ;;  %7192 = vst [vmem:[#allocation45_spill] sm:$0xff] %v6786_v37 }
 0x1bb   : > { %7191 = vst [vmem:[#allocation44_spill] sm:$0xff] %v6784_v29  ;;  %v6792_v34 = vpop.f32.mrf.mxu0  ;;  %v2454_v29 = vadd.f32 %v6669_v53, %v6572_v23  ;;  %v2846_v53 = vadd.f32 %v6675_v24, %v2453_v35  ;;  %v2457_v24 = vadd.f32 %v6696_v36, %v6587_v30  ;;  %v2851_v30 = vadd.f32 %v6691_v41, %v2458_v8 }
 0x1bc   : > { %v6790_v56 = vpop.f32.mrf.mxu1  ;;  %7194 = vst [vmem:[#allocation47_spill] sm:$0xff] %v6792_v34 }
 0x1bd   : > { %7193 = vst [vmem:[#allocation46_spill] sm:$0xff] %v6790_v56  ;;  %v6798_v52 = vpop.f32.mrf.mxu0 }
 0x1be   : > { %v6796_v47 = vpop.f32.mrf.mxu1  ;;  %7196 = vst [vmem:[#allocation49_spill] sm:$0xff] %v6798_v52  ;;  %v2847_v52 = vadd.f32 %v6671_v9, %v2454_v29 }
 0x1bf   : > { %7195 = vst [vmem:[#allocation48_spill] sm:$0xff] %v6796_v47  ;;  %v5163_v6 = vpop.f32.mrf.mxu0 }
 0x1c0   : > { %v5113_v37 = vpop.f32.mrf.mxu1 }
 0x1c1   : > { %v3235_v34 = vadd.f32 %v5113_v37, %v2845_v16  ;;  %v3465_v47 = vpop.f32.mrf.mxu0  ;;  %v2849_v37 = vadd.f32 %v6679_v18, %v2456_v11 }
 0x1c2   : > { %v3075_v3 = vpop.f32.mrf.mxu1 }
 0x1c3   : > { %v3625_v58 = vadd.f32 %v5163_v6, %v3235_v34  ;;  %v3234_v48 = vadd.f32 %v3075_v3, %v2844_v32  ;;  %v5166_v23 = vpop.f32.mrf.mxu0  ;;  %v2460_v32 = vadd.f32 %v6700_v12, %v6590_v17  ;;  %v2459_v12 = vadd.f32 %v6704_v59, %v6593_v55 }
 0x1c4   : > { %v5116_v56 = vpop.f32.mrf.mxu1 }
 0x1c5   : > { %3657 = vst [vmem:[%s6813_s9 + $0x8] sm:$0xff] %v3625_v58  ;;  %v3624_v46 = vadd.f32 %v3465_v47, %v3234_v48  ;;  %v3237_v28 = vadd.f32 %v5116_v56, %v2847_v52  ;;  %v3730_v29 = vmul.f32 %v3625_v58, %v3625_v58  ;;  %v3475_v16 = vpop.f32.mrf.mxu0  ;;  %v2848_v56 = vadd.f32 %v6686_v7, %v2455_v49 }
 0x1c6   : > { %v3085_v34 = vpop.f32.mrf.mxu1  ;;  %v2850_v7 = vadd.f32 %v6698_v22, %v2457_v24  ;;  %v2853_v17 = vadd.f32 %v6702_v50, %v2460_v32  ;;  %v2852_v24 = vadd.f32 %v6706_v13, %v2459_v12 }
 0x1c7   : > { %3656 = vst [vmem:[%s6813_s9] sm:$0xff] %v3624_v46  ;;  %v3689_v6 = vadd.f32 %v3625_v58, %v3624_v46  ;;  %v3729_v10 = vmul.f32 %v3624_v46, %v3624_v46  ;;  %v3627_v9 = vadd.f32 %v5166_v23, %v3237_v28  ;;  %v3236_v39 = vadd.f32 %v3085_v34, %v2846_v53  ;;  %v5169_v52 = vpop.f32.mrf.mxu0 }
 0x1c8   : > { %v5119_v47 = vpop.f32.mrf.mxu1  ;;  %v2462_v28 = vadd.f32 %v6708_v45, %v6596_v14 }
 0x1c9   : > { %v3761_v26 = vadd.f32 %v3730_v29, %v3729_v10  ;;  %3659 = vst [vmem:[%s6813_s9 + $0x18] sm:$0xff] %v3627_v9  ;;  %v3626_v18 = vadd.f32 %v3475_v16, %v3236_v39  ;;  %v3239_v15 = vadd.f32 %v5119_v47, %v2849_v37  ;;  %v3485_v11 = vpop.f32.mrf.mxu0  ;;  %v3732_v23 = vmul.f32 %v3627_v9, %v3627_v9 }
 0x1ca   : > { %v3095_v35 = vpop.f32.mrf.mxu1  ;;  %v2461_v10 = vadd.f32 %v6712_v40, %v6599_v51  ;;  %v2855_v47 = vadd.f32 %v6710_v25, %v2462_v28 }
 0x1cb   : > { %3658 = vst [vmem:[%s6813_s9 + $0x10] sm:$0xff] %v3626_v18  ;;  %v3690_v3 = vadd.f32 %v3689_v6, %v3626_v18  ;;  %v3731_v27 = vmul.f32 %v3626_v18, %v3626_v18  ;;  %v3629_v63 = vadd.f32 %v5169_v52, %v3239_v15  ;;  %v3238_v58 = vadd.f32 %v3095_v35, %v2848_v56  ;;  %v5172_v48 = vpop.f32.mrf.mxu0 }
 0x1cc   : > { %v5122_v36 = vpop.f32.mrf.mxu1  ;;  %v2464_v52 = vadd.f32 %v6716_v4, %v6602_v60  ;;  %v2854_v32 = vadd.f32 %v6714_v31, %v2461_v10  ;;  %v2463_v35 = vadd.f32 %v6720_v0, %v6605_v42  ;;  %v2466_v31 = vadd.f32 %v6724_v5, %v6608_v1 }
 0x1cd   : > { %v3762_v53 = vadd.f32 %v3761_v26, %v3731_v27  ;;  %3661 = vst [vmem:[%s6813_s9 + $0x28] sm:$0xff] %v3629_v63  ;;  %v3628_v49 = vadd.f32 %v3485_v11, %v3238_v58  ;;  %v3691_v46 = vadd.f32 %v3690_v3, %v3627_v9  ;;  %v3241_v37 = vadd.f32 %v5122_v36, %v2851_v30  ;;  %v3495_v41 = vpop.f32.mrf.mxu0 }
 0x1ce   : > { %v3105_v29 = vpop.f32.mrf.mxu1  ;;  %v3734_v50 = vmul.f32 %v3629_v63, %v3629_v63  ;;  %v2468_v1 = vadd.f32 %v6732_v33, %v6614_v54  ;;  %v2467_v54 = vadd.f32 %v6736_v57, %v6617_v44 }
 0x1cf   : > { %3660 = vst [vmem:[%s6813_s9 + $0x20] sm:$0xff] %v3628_v49  ;;  %v3692_v22 = vadd.f32 %v3691_v46, %v3628_v49  ;;  %v3733_v34 = vmul.f32 %v3628_v49, %v3628_v49  ;;  %v3763_v16 = vadd.f32 %v3762_v53, %v3732_v23  ;;  %v3240_v6 = vadd.f32 %v3105_v29, %v2850_v7  ;;  %v5175_v55 = vpop.f32.mrf.mxu0 }
 0x1d0   : > { %v3631_v9 = vadd.f32 %v5172_v48, %v3241_v37  ;;  %v5125_v39 = vpop.f32.mrf.mxu1  ;;  %v2856_v46 = vadd.f32 %v6722_v2, %v2463_v35 }
 0x1d1   : > { %v3764_v59 = vadd.f32 %v3763_v16, %v3733_v34  ;;  %v3630_v8 = vadd.f32 %v3495_v41, %v3240_v6  ;;  %v3693_v14 = vadd.f32 %v3692_v22, %v3629_v63  ;;  %v3243_v45 = vadd.f32 %v5125_v39, %v2853_v17  ;;  %v3505_v26 = vpop.f32.mrf.mxu0 }
 0x1d2   : > { %3663 = vst [vmem:[%s6813_s9 + $0x38] sm:$0xff] %v3631_v9  ;;  %v3115_v56 = vpop.f32.mrf.mxu1  ;;  %v3736_v3 = vmul.f32 %v3631_v9, %v3631_v9  ;;  %v2857_v63 = vadd.f32 %v6718_v19, %v2464_v52  ;;  %v2465_v19 = vadd.f32 %v6728_v20, %v6611_v38  ;;  %v2859_v22 = vadd.f32 %v6726_v43, %v2466_v31 }
 0x1d3   : > { %3662 = vst [vmem:[%s6813_s9 + $0x30] sm:$0xff] %v3630_v8  ;;  %v3694_v51 = vadd.f32 %v3693_v14, %v3630_v8  ;;  %v3735_v40 = vmul.f32 %v3630_v8, %v3630_v8  ;;  %v3765_v18 = vadd.f32 %v3764_v59, %v3734_v50  ;;  %v3633_v15 = vadd.f32 %v5175_v55, %v3243_v45  ;;  %v5178_v11 = vpop.f32.mrf.mxu0  ;;  %v7197_v45 = vld [vmem:[#allocation19_spill] sm:$0xff] }
 0x1d4   : > { %v3242_v13 = vadd.f32 %v3115_v56, %v2852_v24  ;;  %v5128_v25 = vpop.f32.mrf.mxu1  ;;  %v2858_v50 = vadd.f32 %v6730_v61, %v2465_v19  ;;  %v2861_v39 = vadd.f32 %v6734_v21, %v2468_v1  ;;  %v7198_v24 = vld [vmem:[#allocation34_spill] sm:$0xff] }
 0x1d5   : > { %v3766_v60 = vadd.f32 %v3765_v18, %v3735_v40  ;;  %3665 = vst [vmem:[%s6813_s9 + $0x48] sm:$0xff] %v3633_v15  ;;  %v3695_v4 = vadd.f32 %v3694_v51, %v3631_v9  ;;  %v3245_v27 = vadd.f32 %v5128_v25, %v2855_v47  ;;  %v3515_v7 = vpop.f32.mrf.mxu0  ;;  %v3738_v5 = vmul.f32 %v3633_v15, %v3633_v15  ;;  %v7199_v40 = vld [vmem:[#allocation33_spill] sm:$0xff]  ;;  %v7200_v18 = vld [vmem:[#allocation20_spill] sm:$0xff]  ;;  %v7206_v19 = vld [vmem:[#allocation22_spill] sm:$0xff] }
 0x1d6   : > { %v3632_v58 = vadd.f32 %v3505_v26, %v3242_v13  ;;  %v3125_v30 = vpop.f32.mrf.mxu1  ;;  %v2470_v47 = vadd.f32 %v7198_v24, %v7197_v45  ;;  %v2860_v21 = vadd.f32 %v7199_v40, %v2467_v54  ;;  %v7202_v25 = vld [vmem:[#allocation21_spill] sm:$0xff]  ;;  %v7214_v24 = vld [vmem:[#allocation8_spill] sm:$0xff] }
 0x1d7   : > { %v3767_v36 = vadd.f32 %v3766_v60, %v3736_v3  ;;  %v3635_v42 = vadd.f32 %v5178_v11, %v3245_v27  ;;  %v3244_v0 = vadd.f32 %v3125_v30, %v2854_v32  ;;  %v5181_v49 = vpop.f32.mrf.mxu0  ;;  %v7203_v11 = vld [vmem:[#allocation36_spill] sm:$0xff]  ;;  %v7204_v30 = vld [vmem:[#allocation35_spill] sm:$0xff]  ;;  %v7213_v45 = vld [vmem:[#allocation25_spill] sm:$0xff] }
 0x1d8   : > { %3664 = vst [vmem:[%s6813_s9 + $0x40] sm:$0xff] %v3632_v58  ;;  %v3696_v48 = vadd.f32 %v3695_v4, %v3632_v58  ;;  %v3737_v23 = vmul.f32 %v3632_v58, %v3632_v58  ;;  %v5131_v53 = vpop.f32.mrf.mxu1  ;;  %v2472_v3 = vadd.f32 %v7203_v11, %v7202_v25  ;;  %v7216_v25 = vld [vmem:[#allocation12_spill] sm:$0xff] }
 0x1d9   : > { %3667 = vst [vmem:[%s6813_s9 + $0x58] sm:$0xff] %v3635_v42  ;;  %v3634_v17 = vadd.f32 %v3515_v7, %v3244_v0  ;;  %v3247_v12 = vadd.f32 %v5131_v53, %v2857_v63  ;;  %v3525_v41 = vpop.f32.mrf.mxu0  ;;  %v3740_v43 = vmul.f32 %v3635_v42, %v3635_v42  ;;  %v2863_v7 = vadd.f32 %v7204_v30, %v2470_v47 }
 0x1da   : > { %v3768_v28 = vadd.f32 %v3767_v36, %v3737_v23  ;;  %v3697_v37 = vadd.f32 %v3696_v48, %v3633_v15  ;;  %v3135_v29 = vpop.f32.mrf.mxu1  ;;  %v7201_v15 = vld [vmem:[#allocation37_spill] sm:$0xff]  ;;  %v2476_v47 = vadd.f32 %v7214_v24, %v7213_v45 }
 0x1db   : > { %3666 = vst [vmem:[%s6813_s9 + $0x50] sm:$0xff] %v3634_v17  ;;  %v3739_v34 = vmul.f32 %v3634_v17, %v3634_v17  ;;  %v3637_v2 = vadd.f32 %v5181_v49, %v3247_v12  ;;  %v3246_v16 = vadd.f32 %v3135_v29, %v2856_v46  ;;  %v5184_v10 = vpop.f32.mrf.mxu0  ;;  %v2469_v32 = vadd.f32 %v7201_v15, %v7200_v18  ;;  %v7205_v49 = vld [vmem:[#allocation38_spill] sm:$0xff]  ;;  %v7228_v24 = vld [vmem:[#allocation41_spill] sm:$0xff] }
 0x1dc   : > { %v3698_v6 = vadd.f32 %v3697_v37, %v3634_v17  ;;  %v3769_v38 = vadd.f32 %v3768_v28, %v3738_v5  ;;  %v5134_v20 = vpop.f32.mrf.mxu1  ;;  %v2471_v17 = vadd.f32 %v6752_v62, %v7206_v19  ;;  %v7207_v5 = vld [vmem:[#allocation9_spill] sm:$0xff] }
 0x1dd   : > { %3669 = vst [vmem:[%s6813_s9 + $0x68] sm:$0xff] %v3637_v2  ;;  %v3636_v33 = vadd.f32 %v3525_v41, %v3246_v16  ;;  %v3249_v9 = vadd.f32 %v5134_v20, %v2859_v22  ;;  %v3535_v14 = vpop.f32.mrf.mxu0  ;;  %v3742_v60 = vmul.f32 %v3637_v2, %v3637_v2  ;;  %v2862_v46 = vadd.f32 %v7205_v49, %v2469_v32  ;;  %v7209_v16 = vld [vmem:[#allocation11_spill] sm:$0xff] }
 0x1de   : > { %v3770_v55 = vadd.f32 %v3769_v38, %v3739_v34  ;;  %v3699_v59 = vadd.f32 %v3698_v6, %v3635_v42  ;;  %v3145_v8 = vpop.f32.mrf.mxu1  ;;  %v2865_v28 = vadd.f32 %v7207_v5, %v2472_v3  ;;  %v7217_v3 = vld [vmem:[#allocation26_spill] sm:$0xff] }
 0x1df   : > { %3668 = vst [vmem:[%s6813_s9 + $0x60] sm:$0xff] %v3636_v33  ;;  %v3741_v52 = vmul.f32 %v3636_v33, %v3636_v33  ;;  %v3639_v61 = vadd.f32 %v5184_v10, %v3249_v9  ;;  %v3248_v56 = vadd.f32 %v3145_v8, %v2858_v50  ;;  %v5187_v51 = vpop.f32.mrf.mxu0  ;;  %v7210_v9 = vld [vmem:[#allocation10_spill] sm:$0xff] }
 0x1e0   : > { %v3700_v26 = vadd.f32 %v3699_v59, %v3636_v33  ;;  %v3771_v44 = vadd.f32 %v3770_v55, %v3740_v43  ;;  %v5137_v57 = vpop.f32.mrf.mxu1  ;;  %v7211_v43 = vld [vmem:[#allocation24_spill] sm:$0xff]  ;;  %v7212_v55 = vld [vmem:[#allocation13_spill] sm:$0xff] }
 0x1e1   : > { %3671 = vst [vmem:[%s6813_s9 + $0x78] sm:$0xff] %v3639_v61  ;;  %v3638_v35 = vadd.f32 %v3535_v14, %v3248_v56  ;;  %v3251_v13 = vadd.f32 %v5137_v57, %v2861_v39  ;;  %v3545_v58 = vpop.f32.mrf.mxu0  ;;  %v3744_v37 = vmul.f32 %v3639_v61, %v3639_v61  ;;  %v2864_v39 = vadd.f32 %v7210_v9, %v2471_v17  ;;  %v7215_v57 = vld [vmem:[#allocation39_spill] sm:$0xff] }
 0x1e2   : > { %v3772_v4 = vadd.f32 %v3771_v44, %v3741_v52  ;;  %v3701_v27 = vadd.f32 %v3700_v26, %v3637_v2  ;;  %v3155_v63 = vpop.f32.mrf.mxu1  ;;  %v7208_v2 = vld [vmem:[#allocation23_spill] sm:$0xff]  ;;  %v2473_v59 = vadd.f32 %v7212_v55, %v7211_v43 }
 0x1e3   : > { %3670 = vst [vmem:[%s6813_s9 + $0x70] sm:$0xff] %v3638_v35  ;;  %v3743_v31 = vmul.f32 %v3638_v35, %v3638_v35  ;;  %v3641_v36 = vadd.f32 %v5187_v51, %v3251_v13  ;;  %v3250_v42 = vadd.f32 %v3155_v63, %v2860_v21  ;;  %v5190_v53 = vpop.f32.mrf.mxu0  ;;  %v2474_v6 = vadd.f32 %v7209_v16, %v7208_v2  ;;  %v7225_v16 = vld [vmem:[#allocation29_spill] sm:$0xff] }
 0x1e4   : > { %v3702_v0 = vadd.f32 %v3701_v27, %v3638_v35  ;;  %v3773_v48 = vadd.f32 %v3772_v4, %v3742_v60  ;;  %v5140_v23 = vpop.f32.mrf.mxu1  ;;  %v2866_v11 = vadd.f32 %v7216_v25, %v2473_v59  ;;  %v7218_v60 = vld [vmem:[#allocation14_spill] sm:$0xff] }
 0x1e5   : > { %3673 = vst [vmem:[%s6813_s9 + $0x88] sm:$0xff] %v3641_v36  ;;  %v3640_v12 = vadd.f32 %v3545_v58, %v3250_v42  ;;  %v3253_v1 = vadd.f32 %v5140_v23, %v2863_v7  ;;  %v3555_v34 = vpop.f32.mrf.mxu0  ;;  %v3746_v52 = vmul.f32 %v3641_v36, %v3641_v36  ;;  %v2867_v51 = vadd.f32 %v7215_v57, %v2474_v6  ;;  %v7219_v58 = vld [vmem:[#allocation15_spill] sm:$0xff]  ;;  %v7221_v23 = vld [vmem:[#allocation17_spill] sm:$0xff]  ;;  %v7226_v6 = vld [vmem:[#allocation42_spill] sm:$0xff] }
 0x1e6   : > { %v3774_v29 = vadd.f32 %v3773_v48, %v3743_v31  ;;  %v3703_v41 = vadd.f32 %v3702_v0, %v3639_v61  ;;  %v3165_v22 = vpop.f32.mrf.mxu1  ;;  %v2475_v4 = vadd.f32 %v7218_v60, %v7217_v3  ;;  %v2869_v30 = vadd.f32 %v7219_v58, %v2476_v47  ;;  %v7220_v48 = vld [vmem:[#allocation27_spill] sm:$0xff] }
 0x1e7   : > { %3672 = vst [vmem:[%s6813_s9 + $0x80] sm:$0xff] %v3640_v12  ;;  %v3745_v38 = vmul.f32 %v3640_v12, %v3640_v12  ;;  %v3643_v20 = vadd.f32 %v5190_v53, %v3253_v1  ;;  %v3252_v10 = vadd.f32 %v3165_v22, %v2862_v46  ;;  %v5193_v33 = vpop.f32.mrf.mxu0  ;;  %v2478_v53 = vadd.f32 %v7221_v23, %v7220_v48  ;;  %v7231_v57 = vld [vmem:[#allocation43_spill] sm:$0xff] }
 0x1e8   : > { %v3704_v50 = vadd.f32 %v3703_v41, %v3640_v12  ;;  %v3775_v62 = vadd.f32 %v3774_v29, %v3744_v37  ;;  %v5143_v54 = vpop.f32.mrf.mxu1  ;;  %v7223_v29 = vld [vmem:[#allocation28_spill] sm:$0xff] }
 0x1e9   : > { %3675 = vst [vmem:[%s6813_s9 + $0x98] sm:$0xff] %v3643_v20  ;;  %v3642_v8 = vadd.f32 %v3555_v34, %v3252_v10  ;;  %v3255_v14 = vadd.f32 %v5143_v54, %v2865_v28  ;;  %v3565_v44 = vpop.f32.mrf.mxu0  ;;  %v3748_v7 = vmul.f32 %v3643_v20, %v3643_v20  ;;  %v7222_v28 = vld [vmem:[#allocation16_spill] sm:$0xff] }
 0x1ea   : > { %v3776_v61 = vadd.f32 %v3775_v62, %v3745_v38  ;;  %v3705_v56 = vadd.f32 %v3704_v50, %v3641_v36  ;;  %v3175_v26 = vpop.f32.mrf.mxu1  ;;  %v2868_v37 = vadd.f32 %v7222_v28, %v2475_v4  ;;  %v7224_v41 = vld [vmem:[#allocation40_spill] sm:$0xff]  ;;  %v2480_v38 = vadd.f32 %v7226_v6, %v7225_v16 }
 0x1eb   : > { %3674 = vst [vmem:[%s6813_s9 + $0x90] sm:$0xff] %v3642_v8  ;;  %v3747_v40 = vmul.f32 %v3642_v8, %v3642_v8  ;;  %v3645_v21 = vadd.f32 %v5193_v33, %v3255_v14  ;;  %v3254_v18 = vadd.f32 %v3175_v26, %v2864_v39  ;;  %v5196_v13 = vpop.f32.mrf.mxu0  ;;  %v2477_v22 = vadd.f32 %v7224_v41, %v7223_v29  ;;  %v7227_v33 = vld [vmem:[#allocation18_spill] sm:$0xff] }
 0x1ec   : > { %v3706_v15 = vadd.f32 %v3705_v56, %v3642_v8  ;;  %v3777_v32 = vadd.f32 %v3776_v61, %v3746_v52  ;;  %v5146_v35 = vpop.f32.mrf.mxu1  ;;  %v2871_v9 = vadd.f32 %v7227_v33, %v2478_v53  ;;  %v7229_v52 = vld [vmem:[#allocation30_spill] sm:$0xff]  ;;  %v7230_v61 = vld [vmem:[#allocation44_spill] sm:$0xff] }
 0x1ed   : > { %3677 = vst [vmem:[%s6813_s9 + $0xa8] sm:$0xff] %v3645_v21  ;;  %v3644_v27 = vadd.f32 %v3565_v44, %v3254_v18  ;;  %v3257_v63 = vadd.f32 %v5146_v35, %v2867_v51  ;;  %v3575_v0 = vpop.f32.mrf.mxu0  ;;  %v2870_v47 = vadd.f32 %v7228_v24, %v2477_v22  ;;  %v2479_v56 = vadd.f32 %v7230_v61, %v7229_v52  ;;  %v7232_v35 = vld [vmem:[#allocation31_spill] sm:$0xff] }
 0x1ee   : > { %v3778_v31 = vadd.f32 %v3777_v32, %v3747_v40  ;;  %v3707_v36 = vadd.f32 %v3706_v15, %v3643_v20  ;;  %v3185_v42 = vpop.f32.mrf.mxu1  ;;  %v3750_v20 = vmul.f32 %v3645_v21, %v3645_v21  ;;  %v2873_v51 = vadd.f32 %v7231_v57, %v2480_v38 }
 0x1ef   : > { %3676 = vst [vmem:[%s6813_s9 + $0xa0] sm:$0xff] %v3644_v27  ;;  %v3749_v49 = vmul.f32 %v3644_v27, %v3644_v27  ;;  %v3647_v46 = vadd.f32 %v5196_v13, %v3257_v63  ;;  %v3256_v19 = vadd.f32 %v3185_v42, %v2866_v11  ;;  %v5199_v5 = vpop.f32.mrf.mxu0  ;;  %v7233_v13 = vld [vmem:[#allocation46_spill] sm:$0xff] }
 0x1f0   : > { %v3708_v17 = vadd.f32 %v3707_v36, %v3644_v27  ;;  %v3779_v12 = vadd.f32 %v3778_v31, %v3748_v7  ;;  %v5149_v1 = vpop.f32.mrf.mxu1  ;;  %v2482_v25 = vadd.f32 %v7233_v13, %v7232_v35  ;;  %v7235_v31 = vld [vmem:[#allocation32_spill] sm:$0xff] }
 0x1f1   : > { %3679 = vst [vmem:[%s6813_s9 + $0xb8] sm:$0xff] %v3647_v46  ;;  %v3646_v34 = vadd.f32 %v3575_v0, %v3256_v19  ;;  %v3259_v2 = vadd.f32 %v5149_v1, %v2869_v30  ;;  %v3585_v54 = vpop.f32.mrf.mxu0  ;;  %v3752_v40 = vmul.f32 %v3647_v46, %v3647_v46  ;;  %v7234_v30 = vld [vmem:[#allocation45_spill] sm:$0xff]  ;;  %v7236_v36 = vld [vmem:[#allocation48_spill] sm:$0xff] }
 0x1f2   : > { %v3780_v10 = vadd.f32 %v3779_v12, %v3749_v49  ;;  %v3709_v50 = vadd.f32 %v3708_v17, %v3645_v21  ;;  %v3195_v62 = vpop.f32.mrf.mxu1  ;;  %v2872_v7 = vadd.f32 %v7234_v30, %v2479_v56  ;;  %v2481_v42 = vadd.f32 %v7236_v36, %v7235_v31  ;;  %v7237_v17 = vld [vmem:[#allocation47_spill] sm:$0xff] }
 0x1f3   : > { %3678 = vst [vmem:[%s6813_s9 + $0xb0] sm:$0xff] %v3646_v34  ;;  %v3751_v39 = vmul.f32 %v3646_v34, %v3646_v34  ;;  %v3649_v43 = vadd.f32 %v5199_v5, %v3259_v2  ;;  %v3258_v55 = vadd.f32 %v3195_v62, %v2868_v37  ;;  %v5202_v45 = vpop.f32.mrf.mxu0  ;;  %v2875_v12 = vadd.f32 %v7237_v17, %v2482_v25 }
 0x1f4   : > { %v3710_v59 = vadd.f32 %v3709_v50, %v3646_v34  ;;  %v3781_v8 = vadd.f32 %v3780_v10, %v3750_v20  ;;  %v5152_v14 = vpop.f32.mrf.mxu1  ;;  %v7238_v34 = vld [vmem:[#allocation49_spill] sm:$0xff] }
 0x1f5   : > { %3681 = vst [vmem:[%s6813_s9 + $0xc8] sm:$0xff] %v3649_v43  ;;  %v3648_v26 = vadd.f32 %v3585_v54, %v3258_v55  ;;  %v3261_v44 = vadd.f32 %v5152_v14, %v2871_v9  ;;  %v3595_v32 = vpop.f32.mrf.mxu0  ;;  %v3754_v23 = vmul.f32 %v3649_v43, %v3649_v43  ;;  %v2874_v2 = vadd.f32 %v7238_v34, %v2481_v42 }
 0x1f6   : > { %v3782_v21 = vadd.f32 %v3781_v8, %v3751_v39  ;;  %v3711_v18 = vadd.f32 %v3710_v59, %v3647_v46  ;;  %v3205_v15 = vpop.f32.mrf.mxu1 }
 0x1f7   : > { %3680 = vst [vmem:[%s6813_s9 + $0xc0] sm:$0xff] %v3648_v26  ;;  %v3753_v11 = vmul.f32 %v3648_v26, %v3648_v26  ;;  %v3651_v3 = vadd.f32 %v5202_v45, %v3261_v44  ;;  %v3260_v60 = vadd.f32 %v3205_v15, %v2870_v47  ;;  %v5205_v58 = vpop.f32.mrf.mxu0 }
 0x1f8   : > { %v3712_v4 = vadd.f32 %v3711_v18, %v3648_v26  ;;  %v3783_v27 = vadd.f32 %v3782_v21, %v3752_v40  ;;  %v5155_v63 = vpop.f32.mrf.mxu1 }
 0x1f9   : > { %3683 = vst [vmem:[%s6813_s9 + $0xd8] sm:$0xff] %v3651_v3  ;;  %v3650_v0 = vadd.f32 %v3595_v32, %v3260_v60  ;;  %v3263_v48 = vadd.f32 %v5155_v63, %v2873_v51  ;;  %v3605_v19 = vpop.f32.mrf.mxu0  ;;  %v3756_v38 = vmul.f32 %v3651_v3, %v3651_v3 }
 0x1fa   : > { %v3784_v53 = vadd.f32 %v3783_v27, %v3753_v11  ;;  %v3713_v49 = vadd.f32 %v3712_v4, %v3649_v43  ;;  %v3215_v46 = vpop.f32.mrf.mxu1 }
 0x1fb   : > { %3682 = vst [vmem:[%s6813_s9 + $0xd0] sm:$0xff] %v3650_v0  ;;  %v3755_v1 = vmul.f32 %v3650_v0, %v3650_v0  ;;  %v3653_v5 = vadd.f32 %v5205_v58, %v3263_v48  ;;  %v3262_v28 = vadd.f32 %v3215_v46, %v2872_v7  ;;  %v5208_v22 = vpop.f32.mrf.mxu0 }
 0x1fc   : > { %v3714_v37 = vadd.f32 %v3713_v49, %v3650_v0  ;;  %v3785_v29 = vadd.f32 %v3784_v53, %v3754_v23  ;;  %v5158_v41 = vpop.f32.mrf.mxu1 }
 0x1fd   : > { %3685 = vst [vmem:[%s6813_s9 + $0xe8] sm:$0xff] %v3653_v5  ;;  %v3652_v16 = vadd.f32 %v3605_v19, %v3262_v28  ;;  %v3265_v6 = vadd.f32 %v5158_v41, %v2875_v12  ;;  %v3615_v43 = vpop.f32.mrf.mxu0  ;;  %v3758_v59 = vmul.f32 %v3653_v5, %v3653_v5 }
 0x1fe   : > { %v3786_v20 = vadd.f32 %v3785_v29, %v3755_v1  ;;  %v3715_v10 = vadd.f32 %v3714_v37, %v3651_v3  ;;  %v3225_v50 = vpop.f32.mrf.mxu1 }
 0x1ff   : > { %3684 = vst [vmem:[%s6813_s9 + $0xe0] sm:$0xff] %v3652_v16  ;;  %v3757_v62 = vmul.f32 %v3652_v16, %v3652_v16  ;;  %v3655_v54 = vadd.f32 %v5208_v22, %v3265_v6  ;;  %v3264_v33 = vadd.f32 %v3225_v50, %v2874_v2 }
 0x200   : > { %v3716_v9 = vadd.f32 %v3715_v10, %v3652_v16  ;;  %v3787_v39 = vadd.f32 %v3786_v20, %v3756_v38 }
 0x201   : > { %3687 = vst [vmem:[%s6813_s9 + $0xf8] sm:$0xff] %v3655_v54  ;;  %v3654_v55 = vadd.f32 %v3615_v43, %v3264_v33 }
 0x202   : > { %v3788_v8 = vadd.f32 %v3787_v39, %v3757_v62  ;;  %v3717_v14 = vadd.f32 %v3716_v9, %v3653_v5 }
 0x203   : > { %3686 = vst [vmem:[%s6813_s9 + $0xf0] sm:$0xff] %v3654_v55  ;;  %v3759_v45 = vmul.f32 %v3654_v55, %v3654_v55 }
 0x204   : > { %v3718_v24 = vadd.f32 %v3717_v14, %v3654_v55  ;;  %v3789_v47 = vadd.f32 %v3788_v8, %v3758_v59 }
 0x205   : > { %5288 = shalt.err (!%p5285_p5)
}
 0x206   : > { %s5289_s30 = scalar_lea.hbm %s6930_s21, 4096  ;;  %s5293_s8 = scalar_lea.hbm %s7005_s2, 8192 }
 0x207   : > { %p5290_p6 = scmp.ne.s32.totalorder %s6930_s21, %s5289_s30  ;;  %p5294_p10 = scmp.lt.s32.totalorder %s6930_s21, %s7005_s2 }
 0x208   : > { %p5295_p11 = scmp.lt.s32.totalorder %s5293_s8, %s5289_s30 }
 0x209   : > { %p5291_p7 = pnand %p5290_p6, %p5448_p4 }
 0x20a   : > { %p5296_p12 = por %p5295_p11, %p5294_p10 }
 0x20b   : > { %p5292_p9 = pneg %p5291_p7 }
 0x20d   : > { %p5297_p13 = pnand %p5296_p12, %p5292_p9 }
 0x20f   : > { %5300 = shalt.err (!%p5297_p13)
}
 0x210   : > { %s5385_s18 = smov 128   ;;  %s5386_s19 = smov 8   ;;  %v3760_v52 = vmul.f32 %v3655_v54, %v3655_v54  ;;  %v3719_v61 = vadd.f32 %v3718_v24, %v3655_v54  ;;  %v3790_v56 = vadd.f32 %v3789_v47, %v3759_v45  ;;  %v3688_v13 = vld [vmem:[%s6693_s7] sm:$0x1]  ;;  %v3728_v3 = vld [vmem:[%s6693_s7 + $0x1] sm:$0x1] }
 0x211   : > { %5212 = dma.vmem_to_hbm [thread:$0]  (%p5448_p4), %s6932_s11, 4096, %s6930_s21, %s3801_s23, %s5385_s18, %s5385_s18, %s5386_s19  }
 0x212   : > { %v3720_v26 = vrot.slane %v3719_v61, 4  ;;  %v3791_v44 = vadd.f32 %v3790_v56, %v3760_v52  ;;  %s4458_s11 = sshll.u32 %s5373_s15, 5  ;;  %s3837_s21 = sshll.u32 %s6693_s7, 4  ;;  %s3838_s21 = int_to_ptr.vmem [resolvable:$true] %s3837_s21 }
 0x213   : > { %s3835_s27 = scalar_lea.hbm %s7006_s3, %s4458_s11  ;;  %s3806_s28 = scalar_lea.sflag [#allocation5], %s6682_s5 }
 0x214   : > { %v3721_v57 = vadd.f32 %v3720_v26, %v3719_v61  ;;  %v3792_v51 = vrot.slane %v3791_v44, 4  ;;  %s5301_s29 = scalar_lea.vmem %s3838_s21, 32  ;;  %s5387_s30 = smov [#allocation4]  }
 0x215   : > { %p5302_p0 = scmp.ne.s32.totalorder %s3838_s21, %s5301_s29  ;;  %s5305_s4 = sshll.u32 %s5387_s30, 4  ;;  %s5306_s4 = int_to_ptr.vmem [resolvable:$false] %s5305_s4 }
 0x216   : > { %v3722_v40 = vrot.slane %v3721_v57, 2  ;;  %v3793_v21 = vadd.f32 %v3792_v51, %v3791_v44  ;;  %s5307_s15 = scalar_lea.vmem %s5306_s4, 64  ;;  %p5308_p3 = scmp.lt.s32.totalorder %s3838_s21, %s5306_s4 }
 0x217   : > { %p5303_p1 = pnand %p5302_p0, %p5448_p4  ;;  %p5309_p5 = scmp.lt.s32.totalorder %s5307_s15, %s5301_s29 }
 0x218   : > { %v3723_v18 = vadd.f32 %v3722_v40, %v3721_v57  ;;  %v3794_v15 = vrot.slane %v3793_v21, 2 }
 0x219   : > { %p5304_p2 = pneg %p5303_p1  ;;  %p5310_p6 = por %p5309_p5, %p5308_p3 }
 0x21a   : > { %v3724_v32 = vrot.slane %v3723_v18, 1  ;;  %v3795_v35 = vadd.f32 %v3794_v15, %v3793_v21 }
 0x21b   : > { %p5311_p7 = pnand %p5310_p6, %p5304_p2 }
 0x21c   : > { %v3725_v25 = vadd.f32 %v3724_v32, %v3723_v18  ;;  %v3796_v11 = vrot.slane %v3795_v35, 1 }
 0x21e   : > { %v3726_v60 = vadd.f32 %v3725_v25, %v3688_v13  ;;  %v3797_v4 = vadd.f32 %v3796_v11, %v3795_v35 }
 0x220   : > { %3727 = vst [vmem:[%s6693_s7] sm:$0x1] %v3726_v60  ;;  %v3798_v27 = vadd.f32 %v3797_v4, %v3728_v3 }
 0x222   : > { %3799 = vst [vmem:[%s6693_s7 + $0x1] sm:$0x1] %v3798_v27 }
 0x223   : > { %5314 = shalt.err (!%p5311_p7)
}
 0x224   : > { %s5315_s6 = scalar_lea.hbm %s3835_s27, 32  ;;  %s5319_s8 = scalar_lea.hbm %s7006_s3, 64 }
 0x225   : > { %p5316_p9 = scmp.ne.s32.totalorder %s3835_s27, %s5315_s6  ;;  %p5320_p12 = scmp.lt.s32.totalorder %s3835_s27, %s7006_s3 }
 0x226   : > { %p5321_p13 = scmp.lt.s32.totalorder %s5319_s8, %s5315_s6 }
 0x227   : > { %p5317_p10 = pnand %p5316_p9, %p5448_p4 }
 0x228   : > { %p5322_p0 = por %p5321_p13, %p5320_p12 }
 0x229   : > { %p5318_p11 = pneg %p5317_p10 }
 0x22b   : > { %p5323_p1 = pnand %p5322_p0, %p5318_p11 }
 0x22d   : > { %5326 = shalt.err (!%p5323_p1)
}
 0x22e   : > { %5213 = dma.vmem_to_hbm [thread:$0]  (%p5448_p4), %s3838_s21, 32, %s3835_s27, %s3806_s28  }
 0x22f PF: > { %p5223_p2 = scmp.ge.s32.totalorder %s5381_s17, 2  ;;  %s3849_s18 = sand.u32 1, %s5361_s12  }
 0x230   : > { %s3850_s19 = scalar_lea.sflag [#allocation3], %s3849_s18 }
 0x231   : > { %p5217_p3 = pnand %p5223_p2, %p5455_p8 }
 0x233   : > { %p5218_p5 = pneg %p5217_p3 }
 0x235   : > { %5352 = dma.done.wait (%p5218_p5), %s3850_s19, 4096  }
 0x236   : > { %5354 = vsyncadd (%p5218_p5), %s3850_s19, 4294963200  ;;  %s3859_s11 = scalar_lea.sflag [#allocation5], %s3849_s18 }
 0x237   : > { %5356 = dma.done.wait (%p5218_p5), %s3859_s11, 32  }
 0x238   : > { %5358 = vsyncadd (%p5218_p5), %s3859_s11, 4294967264  ;;  %s20_s17 = sadd.s32 1, %s5381_s17   ;;  %s7239_s12 = smov %s5365_s13 }
 0x239   : > { %p17_p6 = scmp.ge.s32.totalorder %s20_s17, 4   ;;  %s7240_s13 = smov %s5369_s14 }
 0x23a   : > { %s7241_s14 = smov %s5461_s25  ;;  %s7242_s15 = smov %s5377_s16 }
 0x23b   : > { %s7243_s16 = smov %s7245_s20  ;;  %19 = sbr.rel (!%p17_p6) target bundleno = 6 (0x6), region = 95 }
 0x240   :  { %3864 = vsyncpa [#allocation3], 1 }
 0x241   :  { %3866 = vsyncpa [#allocation3 + $0x1], 1 }
 0x242   :  { %3867 = vsyncpa [#allocation5], 1 }
 0x243   :  { %3869 = vsyncpa [#allocation5 + $0x1], 1 }

</bundles_post_ra>
